<compile_context>
chip_gen: v6e
topology: v6e:2x2x1
jax: 0.10.0
libtpu: 0.0.40
codegen_flags: <defaults>
</compile_context>

<pallas_src>
import functools

import jax
import jax.numpy as jnp
from jax.experimental import pallas as pl
from jax.experimental.pallas import tpu as pltpu


OUT_LANES = 128   # lane-dense packed output width: [logits | att_abs, att_title | zero pad]


# ---------------------------------------------------------------------------
# Pallas kernel: pooler dense+tanh + the whole post-BERT head, one VMEM block.
# ---------------------------------------------------------------------------
def head_kernel(nr_classes,
                mean_ref,            # (2B, H)  bf16   masked-mean, [title; abstract]
                pw_ref,              # (H, H)   bf16   pooler dense weight
                w1_ref,              # (H, A1)  bf16   att_l1 weight
                wf_ref,              # (H, 128) bf16   fused prefinal@final, lane-padded
                p_ref,               # (5, H)   f32    packed small params
                out_ref):            # (B, 128) f32    packed output
    B = out_ref.shape[0]
    A1 = w1_ref.shape[1]
    C = nr_classes

    # packed small params (static slices = zero-cost views)
    pool_b = p_ref[0:1, :]                       # (1, H)
    b1 = p_ref[1:2, 0:A1]                        # (1, A1)
    w2 = p_ref[2:3, 0:A1]                        # (1, A1)
    bf = p_ref[3:4, 0:OUT_LANES]                 # (1, 128) fused classifier bias (padded)
    b2 = p_ref[4:5, 0:1]                         # (1, 1)

    # Synthetic BertPooler dense + tanh (bf16 MXU operands, f32 accumulate & elementwise).
    pooled = jnp.tanh(
        jnp.dot(mean_ref[...], pw_ref[...], preferred_element_type=jnp.float32) + pool_b)
    x16 = pooled.astype(jnp.bfloat16)            # MXU operand copy; math stays f32

    # dropout == identity (eval mode).
    # att_l1 + ReLU: both branches in a single stacked MXU matmul.
    h1 = jnp.maximum(
        jnp.dot(x16, w1_ref[...], preferred_element_type=jnp.float32) + b1,
        0.0)                                                           # (2B, A1)

    # att_l2 (out_features = 1) + ReLU as a weighted lane-reduction (XLU slot),
    # avoiding a wasteful N=1 MXU push.
    s = jnp.maximum(jnp.sum(h1 * w2, axis=-1, keepdims=True) + b2, 0.0)  # (2B, 1)

    pt = pooled[0:B, :]
    pa = pooled[B:2 * B, :]
    t2 = s[0:B, :]
    a2 = s[B:2 * B, :]

    # softmax over [abstract, title] per row (matches torch.cat((abstract, title), 1) order)
    m = jnp.maximum(a2, t2)
    ea = jnp.exp(a2 - m)
    et = jnp.exp(t2 - m)
    inv = pl.reciprocal(ea + et, approx=True)    # EUP, otherwise idle
    att_a = ea * inv                             # (B, 1) abstract weight
    att_t = et * inv                             # (B, 1) title weight

    # attention-weighted fusion of the two pooled embeddings (kept f32)
    final = att_a * pa + att_t * pt              # (B, H)

    # prefinal + final classifier folded into ONE matmul; output already 128 lanes wide
    # (lanes [C:128] of wf are zero-padded offline).
    logits128 = jnp.dot(final.astype(jnp.bfloat16), wf_ref[...],
                        preferred_element_type=jnp.float32) + bf        # (B, 128)

    # inject the two attention scalars into the padded-zero lanes C and C+1
    lane = jax.lax.broadcasted_iota(jnp.int32, (B, OUT_LANES), 1)
    packed = jnp.where(lane == C, att_a, logits128)
    packed = jnp.where(lane == C + 1, att_t, packed)
    out_ref[...] = packed                        # single lane-dense store / output DMA


# ---------------------------------------------------------------------------
# Offline parameter preprocessing.
# ---------------------------------------------------------------------------
def fold_params(head_params, bert_params):
    """Fold prefinal@final, lane-pad classifier, cast MXU weights to bf16,
    pack the small f32 vectors into one params block."""
    w1 = head_params["w1"]
    H, A1 = w1.shape
    C = head_params["wf"].shape[1]
    assert C + 2 <= OUT_LANES and A1 <= H and OUT_LANES <= H

    wf_fused = head_params["wp"] @ head_params["wf"]                      # (H, C)
    bf_fused = head_params["bp"] @ head_params["wf"] + head_params["bf"]  # (1, C)
    wf_pad = jnp.zeros((H, OUT_LANES), jnp.float32).at[:, :C].set(wf_fused)

    pblock = jnp.zeros((5, H), jnp.float32)
    pblock = pblock.at[0, :].set(bert_params["pool_b"][0])
    pblock = pblock.at[1, :A1].set(head_params["b1"][0])
    pblock = pblock.at[2, :A1].set(head_params["w2"][0])
    pblock = pblock.at[3, :C].set(bf_fused[0])
    pblock = pblock.at[4, 0].set(head_params["b2"][0, 0])

    return {
        "pool_w_bf16": bert_params["pool_w"].astype(jnp.bfloat16),
        "w1_bf16": w1.astype(jnp.bfloat16),
        # TODO(synk): on v7x only, w1 could optionally be fp8 with a per-column scale;
        # skipped (sub-µs win at this size, and v5e/v6e MXUs have no fp8 path).
        "wf_pad_bf16": wf_pad.astype(jnp.bfloat16),
        "pblock": pblock,
        "nr_classes": C,
    }


def bert_class_head(mean_stacked_bf16, folded):
    """mean_stacked_bf16: (2B, H) bf16, rows [0:B]=title, [B:2B]=abstract."""
    twoB, _ = mean_stacked_bf16.shape
    B = twoB // 2
    C = folded["nr_classes"]
    vmem = pl.BlockSpec(memory_space=pltpu.MemorySpace.VMEM)
    # NOTE: for large production batches add a grid over the row axis
    # (grid=(pl.cdiv(2B, TM),), TM a multiple of 16 for bf16 sublane packing, constant
    # index_maps for all weights, dimension_semantics=("parallel",)) so v7x's second
    # TensorCore gets half the rows; re-derive the tile budget against v7x's 32 MiB scoped
    # VMEM default (64 MiB physical).  At B=2 a single gridless block is smallest-overhead
    # and fully VMEM-resident (~1.8 MiB, also under v5e's 16 MiB scoped default).
    packed = pl.pallas_call(
        functools.partial(head_kernel, C),
        out_shape=jax.ShapeDtypeStruct((B, OUT_LANES), jnp.float32),
        in_specs=[vmem,          # masked-mean stacked (bf16)
                  vmem,          # pool_w (bf16)
                  vmem,          # w1 (bf16)
                  vmem,          # wf_pad (bf16)
                  vmem],         # packed params block (f32)
        out_specs=vmem,
    )(mean_stacked_bf16,
      folded["pool_w_bf16"], folded["w1_bf16"], folded["wf_pad_bf16"], folded["pblock"])
    logits = packed[:, :C]
    att_scalars = packed[:, C:C + 2]     # columns = [abstract, title] (torch.cat order)
    return logits, att_scalars


# ---------------------------------------------------------------------------
# Synthetic stand-in for BertModel(...) (plain JAX glue for the gather part only).
# ---------------------------------------------------------------------------
# TODO(synk): pretrained 'allenai/scibert_scivocab_cased' encoder replaced by a synthetic
# embedding lookup + masked mean; the pooler dense+tanh is fused into the Pallas kernel.
def synthetic_masked_mean(input_ids, attn_mask, token_type_ids, bparams):
    tok = bparams["tok_emb"][input_ids]              # (N, S, H)
    typ = bparams["type_emb"][token_type_ids]        # (N, S, H)
    h = tok + typ
    mask = attn_mask[..., None].astype(jnp.float32)  # (N, S, 1)
    return (h * mask).sum(axis=1) / jnp.maximum(mask.sum(axis=1), 1.0)


def bert_class_forward(input_id_title, attn_mask_title, token_type_ids_title,
                       input_id_abstract, attn_mask_abstract, token_type_ids_abstract,
                       bparams, folded):
    # Stack title/abstract so the (tiny) gather + masked mean runs once and the result is
    # already in the layout the kernel consumes; emit it in bf16 (halves the x DMA).
    ids = jnp.concatenate([input_id_title, input_id_abstract], axis=0)
    mask = jnp.concatenate([attn_mask_title, attn_mask_abstract], axis=0)
    ttid = jnp.concatenate([token_type_ids_title, token_type_ids_abstract], axis=0)
    mean_stacked = synthetic_masked_mean(ids, mask, ttid, bparams)       # (2B, H) f32
    return bert_class_head(mean_stacked.astype(jnp.bfloat16), folded)


# Pure-JAX f32 references (unfused) for the correctness sanity check.
def synthetic_bert_pool_ref(input_ids, attn_mask, token_type_ids, bparams):
    mean = synthetic_masked_mean(input_ids, attn_mask, token_type_ids, bparams)
    return jnp.tanh(mean @ bparams["pool_w"] + bparams["pool_b"])


def head_ref(pt, pa, p):
    t1 = jnp.maximum(pt @ p["w1"] + p["b1"], 0.0)
    a1 = jnp.maximum(pa @ p["w1"] + p["b1"], 0.0)
    t2 = jnp.maximum(jnp.sum(t1 * p["w2"], axis=-1, keepdims=True) + p["b2"], 0.0)
    a2 = jnp.maximum(jnp.sum(a1 * p["w2"], axis=-1, keepdims=True) + p["b2"], 0.0)
    cat = jnp.concatenate([a2, t2], axis=1)
    att = jax.nn.softmax(cat, axis=1)
    final = att[:, 0:1] * pa + att[:, 1:2] * pt
    pre = final @ p["wp"] + p["bp"]
    return pre @ p["wf"] + p["bf"], att


if __name__ == "__main__":
    # Module sizes (from __init__): bert_size=768, att_layer_1=256, att_layer_2=1,
    # pre_output=256; nr_classes chosen synthetically.
    B, S, H, A1, P, C, VOCAB = 2, 8, 768, 256, 256, 8, 100

    key = jax.random.PRNGKey(0)
    ks = jax.random.split(key, 16)

    # Head parameters (weights stored (in, out) = PyTorch W.T), deterministic.
    params = {
        "w1": 0.02 * jax.random.normal(ks[0], (H, A1), jnp.float32),
        "b1": 0.01 * jax.random.normal(ks[1], (1, A1), jnp.float32),
        "w2": 0.02 * jax.random.normal(ks[2], (1, A1), jnp.float32),   # att_l2 weight row vector
        "b2": 0.01 * jax.random.normal(ks[3], (1, 1), jnp.float32),
        "wp": 0.02 * jax.random.normal(ks[4], (H, P), jnp.float32),
        "bp": 0.01 * jax.random.normal(ks[5], (1, P), jnp.float32),
        "wf": 0.02 * jax.random.normal(ks[6], (P, C), jnp.float32),
        "bf": 0.01 * jax.random.normal(ks[7], (1, C), jnp.float32),
    }

    # Synthetic-BERT parameters.
    bparams = {
        "tok_emb": 0.02 * jax.random.normal(ks[8], (VOCAB, H), jnp.float32),
        "type_emb": 0.02 * jax.random.normal(ks[9], (2, H), jnp.float32),
        "pool_w": 0.02 * jax.random.normal(ks[10], (H, H), jnp.float32),
        "pool_b": 0.01 * jax.random.normal(ks[11], (1, H), jnp.float32),
    }

    folded = fold_params(params, bparams)

    # Example inputs (deterministic).
    input_id_title = jax.random.randint(ks[12], (B, S), 0, VOCAB, jnp.int32)
    input_id_abstract = jax.random.randint(ks[13], (B, S), 0, VOCAB, jnp.int32)
    attn_mask_title = jnp.ones((B, S), jnp.int32).at[:, -2:].set(0)
    attn_mask_abstract = jnp.ones((B, S), jnp.int32)
    token_type_ids_title = jnp.zeros((B, S), jnp.int32)
    token_type_ids_abstract = jnp.zeros((B, S), jnp.int32)

    logits, att_scalars = bert_class_forward(
        input_id_title, attn_mask_title, token_type_ids_title,
        input_id_abstract, attn_mask_abstract, token_type_ids_abstract,
        bparams, folded)
    jax.block_until_ready((logits, att_scalars))

    # Sanity check against a pure-JAX f32 reference of the (unfused) pooler + head.
    pt = synthetic_bert_pool_ref(input_id_title, attn_mask_title, token_type_ids_title, bparams)
    pa = synthetic_bert_pool_ref(input_id_abstract, attn_mask_abstract, token_type_ids_abstract,
                                 bparams)
    ref_logits, ref_att = head_ref(pt, pa, params)
    assert logits.shape == (B, C) and att_scalars.shape == (B, 2)
    assert jnp.allclose(logits, ref_logits, atol=2e-2, rtol=2e-2)
    assert jnp.allclose(att_scalars, ref_att, atol=5e-3, rtol=5e-3)

    print("KERNEL_OK")
</pallas_src>

<mosaic_0001>
module attributes {stable_mosaic.version = 11 : i64} {
  func.func @head_kernel(%arg0: memref<4x768xbf16, #tpu.memory_space<vmem>>, %arg1: memref<768x768xbf16, #tpu.memory_space<vmem>>, %arg2: memref<768x256xbf16, #tpu.memory_space<vmem>>, %arg3: memref<768x128xbf16, #tpu.memory_space<vmem>>, %arg4: memref<5x768xf32, #tpu.memory_space<vmem>>, %arg5: memref<2x128xf32, #tpu.memory_space<vmem>>) attributes {dimension_semantics = [], scalar_prefetch = 0 : i64, scratch_operands = 0 : i64, tpu.core_type = #tpu.core_type<tc>} {
    %c0 = arith.constant 0 : index
    %c0_0 = arith.constant 0 : index
    %0 = vector.load %arg4[%c0, %c0_0] : memref<5x768xf32, #tpu.memory_space<vmem>>, vector<1x768xf32>
    %c1 = arith.constant 1 : index
    %c0_1 = arith.constant 0 : index
    %1 = vector.load %arg4[%c1, %c0_1] : memref<5x768xf32, #tpu.memory_space<vmem>>, vector<1x256xf32>
    %c2 = arith.constant 2 : index
    %c0_2 = arith.constant 0 : index
    %2 = vector.load %arg4[%c2, %c0_2] : memref<5x768xf32, #tpu.memory_space<vmem>>, vector<1x256xf32>
    %c3 = arith.constant 3 : index
    %c0_3 = arith.constant 0 : index
    %3 = vector.load %arg4[%c3, %c0_3] : memref<5x768xf32, #tpu.memory_space<vmem>>, vector<1x128xf32>
    %c4 = arith.constant 4 : index
    %c0_4 = arith.constant 0 : index
    %4 = vector.load %arg4[%c4, %c0_4] : memref<5x768xf32, #tpu.memory_space<vmem>>, vector<1x1xf32>
    %c0_5 = arith.constant 0 : index
    %c0_6 = arith.constant 0 : index
    %5 = vector.load %arg0[%c0_5, %c0_6] : memref<4x768xbf16, #tpu.memory_space<vmem>>, vector<4x768xbf16>
    %c0_7 = arith.constant 0 : index
    %c0_8 = arith.constant 0 : index
    %6 = vector.load %arg1[%c0_7, %c0_8] : memref<768x768xbf16, #tpu.memory_space<vmem>>, vector<768x768xbf16>
    %cst = arith.constant dense<0.000000e+00> : vector<4x768xf32>
    %7 = tpu.matmul %5, %6, %cst {dimension_numbers = #tpu.dot_dimension_numbers<[1], [0], [0], [1], [0, 0, 1, 1], [], []>} : vector<4x768xbf16>, vector<768x768xbf16>, vector<4x768xf32> -> vector<4x768xf32>
    %8 = vector.broadcast %0 : vector<1x768xf32> to vector<4x768xf32>
    %9 = arith.addf %7, %8 : vector<4x768xf32>
    %10 = math.tanh %9 : vector<4x768xf32>
    %11 = arith.truncf %10 : vector<4x768xf32> to vector<4x768xbf16>
    %c0_9 = arith.constant 0 : index
    %c0_10 = arith.constant 0 : index
    %12 = vector.load %arg2[%c0_9, %c0_10] : memref<768x256xbf16, #tpu.memory_space<vmem>>, vector<768x256xbf16>
    %cst_11 = arith.constant dense<0.000000e+00> : vector<4x256xf32>
    %13 = tpu.matmul %11, %12, %cst_11 {dimension_numbers = #tpu.dot_dimension_numbers<[1], [0], [0], [1], [0, 0, 1, 1], [], []>} : vector<4x768xbf16>, vector<768x256xbf16>, vector<4x256xf32> -> vector<4x256xf32>
    %14 = vector.broadcast %1 : vector<1x256xf32> to vector<4x256xf32>
    %15 = arith.addf %13, %14 : vector<4x256xf32>
    %cst_12 = arith.constant 0.000000e+00 : f32
    %16 = vector.broadcast %cst_12 : f32 to vector<4x256xf32>
    %17 = arith.maximumf %15, %16 : vector<4x256xf32>
    %18 = vector.broadcast %2 : vector<1x256xf32> to vector<4x256xf32>
    %19 = arith.mulf %17, %18 : vector<4x256xf32>
    %cst_13 = arith.constant dense<0.000000e+00> : vector<4xf32>
    %20 = vector.multi_reduction <add>, %19, %cst_13 [1] : vector<4x256xf32> to vector<4xf32>
    %21 = vector.shape_cast %20 : vector<4xf32> to vector<4x1xf32>
    %22 = vector.broadcast %4 : vector<1x1xf32> to vector<4x1xf32>
    %23 = arith.addf %21, %22 : vector<4x1xf32>
    %cst_14 = arith.constant 0.000000e+00 : f32
    %24 = vector.broadcast %cst_14 : f32 to vector<4x1xf32>
    %25 = arith.maximumf %23, %24 : vector<4x1xf32>
    %26 = vector.extract_strided_slice %10 {offsets = [0, 0], sizes = [2, 768], strides = [1, 1]} : vector<4x768xf32> to vector<2x768xf32>
    %27 = vector.extract_strided_slice %10 {offsets = [2, 0], sizes = [2, 768], strides = [1, 1]} : vector<4x768xf32> to vector<2x768xf32>
    %28 = vector.extract_strided_slice %25 {offsets = [0, 0], sizes = [2, 1], strides = [1, 1]} : vector<4x1xf32> to vector<2x1xf32>
    %29 = vector.extract_strided_slice %25 {offsets = [2, 0], sizes = [2, 1], strides = [1, 1]} : vector<4x1xf32> to vector<2x1xf32>
    %30 = arith.maximumf %29, %28 : vector<2x1xf32>
    %31 = arith.subf %29, %30 : vector<2x1xf32>
    %32 = math.exp %31 : vector<2x1xf32>
    %33 = arith.subf %28, %30 : vector<2x1xf32>
    %34 = math.exp %33 : vector<2x1xf32>
    %35 = arith.addf %32, %34 : vector<2x1xf32>
    %36 = tpu.reciprocal %35 {approx = true} : vector<2x1xf32> -> vector<2x1xf32>
    %37 = arith.mulf %32, %36 : vector<2x1xf32>
    %38 = arith.mulf %34, %36 : vector<2x1xf32>
    %39 = vector.broadcast %37 : vector<2x1xf32> to vector<2x768xf32>
    %40 = arith.mulf %39, %27 : vector<2x768xf32>
    %41 = vector.broadcast %38 : vector<2x1xf32> to vector<2x768xf32>
    %42 = arith.mulf %41, %26 : vector<2x768xf32>
    %43 = arith.addf %40, %42 : vector<2x768xf32>
    %44 = arith.truncf %43 : vector<2x768xf32> to vector<2x768xbf16>
    %c0_15 = arith.constant 0 : index
    %c0_16 = arith.constant 0 : index
    %45 = vector.load %arg3[%c0_15, %c0_16] : memref<768x128xbf16, #tpu.memory_space<vmem>>, vector<768x128xbf16>
    %cst_17 = arith.constant dense<0.000000e+00> : vector<2x128xf32>
    %46 = tpu.matmul %44, %45, %cst_17 {dimension_numbers = #tpu.dot_dimension_numbers<[1], [0], [0], [1], [0, 0, 1, 1], [], []>} : vector<2x768xbf16>, vector<768x128xbf16>, vector<2x128xf32> -> vector<2x128xf32>
    %47 = vector.broadcast %3 : vector<1x128xf32> to vector<2x128xf32>
    %48 = arith.addf %46, %47 : vector<2x128xf32>
    %49 = tpu.iota {dimensions = array<i32: 1>} : vector<2x128xi32>
    %c8_i32 = arith.constant 8 : i32
    %50 = vector.broadcast %c8_i32 : i32 to vector<2x128xi32>
    %51 = arith.cmpi eq, %49, %50 : vector<2x128xi32>
    %52 = vector.shape_cast %37 : vector<2x1xf32> to vector<2x1xf32>
    %53 = vector.broadcast %52 : vector<2x1xf32> to vector<2x128xf32>
    %54 = arith.select %51, %53, %48 : vector<2x128xi1>, vector<2x128xf32>
    %c9_i32 = arith.constant 9 : i32
    %55 = vector.broadcast %c9_i32 : i32 to vector<2x128xi32>
    %56 = arith.cmpi eq, %49, %55 : vector<2x128xi32>
    %57 = vector.shape_cast %38 : vector<2x1xf32> to vector<2x1xf32>
    %58 = vector.broadcast %57 : vector<2x1xf32> to vector<2x128xf32>
    %59 = arith.select %56, %58, %54 : vector<2x128xi1>, vector<2x128xf32>
    %c0_18 = arith.constant 0 : index
    %c0_19 = arith.constant 0 : index
    %60 = vector.load %arg5[%c0_18, %c0_19] : memref<2x128xf32, #tpu.memory_space<vmem>>, vector<2x128xf32>
    tpu.vector_store %arg5[%c0_18, %c0_19], %59 {strides = array<i32>} : memref<2x128xf32, #tpu.memory_space<vmem>>, vector<2x128xf32>,
    return
  }
}

</mosaic_0001>

<bundles_post_ra>
// kernel: tpu_custom_call.1
= control target key start
LH: loop header
LB: loop body
LE: loop exit
PB: predicated region body
PF: predicated region fallthrough
CT: control target
= control target key end

     0   :  { %10 = vsyncpa [#allocation3], 0  ;;  %s5115_s0 = inlined_call_operand.hbm [shape: bf16[4,768], index: 0, kind: input, shape index: {}]   ;;  %s5116_s1 = inlined_call_operand.hbm [shape: bf16[768,768], index: 1, kind: input, shape index: {}]   ;;  %s5117_s2 = inlined_call_operand.hbm [shape: bf16[768,256], index: 2, kind: input, shape index: {}]   ;;  %s5118_s3 = inlined_call_operand.hbm [shape: bf16[768,128], index: 3, kind: input, shape index: {}]   ;;  %s5119_s4 = inlined_call_operand.hbm [shape: f32[5,768], index: 4, kind: input, shape index: {}]   ;;  %s5120_s5 = inlined_call_operand.hbm [shape: f32[2,128], index: 5, kind: output, shape index: {}]  }
   0x1   :  { %11 = vsyncpa [#allocation6], 0 }
   0x2   :  { %12 = vsyncpa [#allocation9], 0 }
   0x3   :  { %13 = vsyncpa [#allocation4], 0  ;;  %s4917_s18 = smov [#allocation5]  }
   0x4   :  { %s29_s19 = sshll.u32 %s4917_s18, 4  ;;  %s30_s19 = int_to_ptr.vmem [resolvable:$true] %s29_s19 }
   0x5   :  { %s4797_s20 = scalar_lea.vmem %s30_s19, 36864  ;;  %p4802_p1 = scmp.lt.s32.totalorder %s30_s19, %s30_s19 }
   0x6   :  { %p4798_p0 = scmp.ne.s32.totalorder %s30_s19, %s4797_s20  ;;  %p4803_p2 = scmp.lt.s32.totalorder %s4797_s20, %s4797_s20 }
   0x8   :  { %p4804_p3 = por %p4803_p2, %p4802_p1 }
   0xa   :  { %p4805_p4 = pnand %p4804_p3, %p4798_p0 }
   0xc   :  { %4808 = shalt.err (!%p4805_p4)
}
   0xd   :  { %s4918_s21 = smov 384   ;;  %s4919_s22 = smov 24  }
   0xe   :  { %35 = dma.hbm_to_vmem [thread:$0]  %s5116_s1, 36864, %s30_s19, [#allocation6], %s4918_s21, %s4918_s21, %s4919_s22  }
   0xf   :  { %s4920_s25 = smov [#allocation8]  }
  0x10   :  { %s53_s26 = sshll.u32 %s4920_s25, 4  ;;  %s54_s26 = int_to_ptr.vmem [resolvable:$true] %s53_s26 }
  0x11   :  { %s4817_s27 = scalar_lea.vmem %s54_s26, 6144  ;;  %p4822_p6 = scmp.lt.s32.totalorder %s54_s26, %s54_s26 }
  0x12   :  { %p4818_p5 = scmp.ne.s32.totalorder %s54_s26, %s4817_s27  ;;  %p4823_p7 = scmp.lt.s32.totalorder %s4817_s27, %s4817_s27 }
  0x14   :  { %p4824_p8 = por %p4823_p7, %p4822_p6 }
  0x16   :  { %p4825_p9 = pnand %p4824_p8, %p4818_p5 }
  0x18   :  { %4828 = shalt.err (!%p4825_p9)
}
  0x19   :  { %s4921_s28 = smov 64   ;;  %s4922_s29 = smov 4  }
  0x1a   :  { %59 = dma.hbm_to_vmem [thread:$0]  %s5118_s3, 6144, %s54_s26, [#allocation9], %s4921_s28, %s4921_s28, %s4922_s29  }
  0x1b   :  { %s4923_s7 = smov [#allocation2]   ;;  %s4924_s9 = smov [#allocation7]  }
  0x1c   :  { %s20_s8 = sshll.u32 %s4923_s7, 4  ;;  %s41_s1 = sshll.u32 %s4924_s9, 4  ;;  %s21_s8 = int_to_ptr.vmem [resolvable:$true] %s20_s8  ;;  %s42_s1 = int_to_ptr.vmem [resolvable:$true] %s41_s1 }
  0x1d   :  { %s4837_s10 = scalar_lea.vmem %s21_s8, 192  ;;  %p4842_p11 = scmp.lt.s32.totalorder %s21_s8, %s21_s8 }
  0x1e   :  { %p4838_p10 = scmp.ne.s32.totalorder %s21_s8, %s4837_s10  ;;  %p4843_p12 = scmp.lt.s32.totalorder %s4837_s10, %s4837_s10 }
  0x20   :  { %p4844_p13 = por %p4843_p12, %p4842_p11 }
  0x22   :  { %p4845_p0 = pnand %p4844_p13, %p4838_p10 }
  0x24   :  { %4848 = shalt.err (!%p4845_p0)
}
  0x25   :  { %23 = dma.hbm_to_vmem [thread:$0]  %s5115_s0, 192, %s21_s8, [#allocation3]  }
  0x26   :  { %s4857_s13 = scalar_lea.vmem %s42_s1, 12288  ;;  %p4862_p2 = scmp.lt.s32.totalorder %s42_s1, %s42_s1 }
  0x27   :  { %p4858_p1 = scmp.ne.s32.totalorder %s42_s1, %s4857_s13  ;;  %p4863_p3 = scmp.lt.s32.totalorder %s4857_s13, %s4857_s13 }
  0x29   :  { %p4864_p4 = por %p4863_p3, %p4862_p2 }
  0x2b   :  { %p4865_p5 = pnand %p4864_p4, %p4858_p1 }
  0x2d   :  { %4868 = shalt.err (!%p4865_p5)
}
  0x2e   :  { %s4925_s3 = smov 128   ;;  %s4926_s14 = smov 8  }
  0x2f   :  { %47 = dma.hbm_to_vmem [thread:$0]  %s5117_s2, 12288, %s42_s1, [#allocation6], %s4925_s3, %s4925_s3, %s4926_s14  }
  0x30   :  { %s4927_s17 = smov [#allocation10]  }
  0x31   :  { %s66_s18 = sshll.u32 %s4927_s17, 4  ;;  %s67_s18 = int_to_ptr.vmem [resolvable:$true] %s66_s18 }
  0x32   :  { %s4877_s19 = scalar_lea.vmem %s67_s18, 768  ;;  %p4882_p7 = scmp.lt.s32.totalorder %s67_s18, %s67_s18 }
  0x33   :  { %p4878_p6 = scmp.ne.s32.totalorder %s67_s18, %s4877_s19  ;;  %p4883_p8 = scmp.lt.s32.totalorder %s4877_s19, %s4877_s19 }
  0x35   :  { %p4884_p9 = por %p4883_p8, %p4882_p7 }
  0x37   :  { %p4885_p10 = pnand %p4884_p9, %p4878_p6 }
  0x39   :  { %4888 = shalt.err (!%p4885_p10)
}
  0x3a   :  { %69 = dma.hbm_to_vmem [thread:$0]  %s5119_s4, 768, %s67_s18, [#allocation9]  }
  0x3b   :  { %4909 = dma.done.wait [#allocation3], 192  }
  0x3c   :  { %4910 = vsyncadd [#allocation3], 4294967104 }
  0x3d   :  { %4911 = dma.done.wait [#allocation6], 49152  }
  0x3e   :  { %4912 = vsyncadd [#allocation6], 4294918144 }
  0x3f   :  { %4913 = dma.done.wait [#allocation9], 6912  }
  0x40   :  { %4914 = vsyncadd [#allocation9], 4294960384  ;;  %v4145_v0 = vld [vmem:[#allocation5 + $0x154] ss:$24 sps:$4 sm:$0xff]   ;;  %v4147_v1 = vld [vmem:[#allocation5 + $0x150] ss:$24 sps:$4 sm:$0xff]   ;;  %v386_v35 = vlaneseq }
  0x41   :  { %1889 = vmatprep.subr.bf16.mxu0 %v4145_v0  ;;  %v4148_v2 = vld [vmem:[#allocation5 + $0x454] ss:$24 sps:$4 sm:$0xff]   ;;  %v4150_v3 = vld [vmem:[#allocation5 + $0x450] ss:$24 sps:$4 sm:$0xff]   ;;  %v4151_v4 = vld [vmem:[#allocation5 + $0x124] ss:$24 sps:$4 sm:$0xff]  }
  0x42   :  { %1890 = vmatpush1.bf16.msra.mxu0 %v4147_v1  ;;  %v4153_v5 = vld [vmem:[#allocation5 + $0x120] ss:$24 sps:$4 sm:$0xff]   ;;  %1930 = vmatprep.subr.bf16.mxu1 %v4148_v2  ;;  %v4154_v6 = vld [vmem:[#allocation5 + $0x424] ss:$24 sps:$4 sm:$0xff]   ;;  %v4157_v8 = vld [vmem:[#allocation5 + $0xf4] ss:$24 sps:$4 sm:$0xff]  }
  0x43   :  { %1931 = vmatpush1.bf16.msra.mxu1 %v4150_v3  ;;  %1891 = vmatprep.subr.bf16.mxu0 %v4151_v4  ;;  %v4156_v7 = vld [vmem:[#allocation5 + $0x420] ss:$24 sps:$4 sm:$0xff]   ;;  %v4159_v9 = vld [vmem:[#allocation5 + $0xf0] ss:$24 sps:$4 sm:$0xff]   ;;  %v4160_v10 = vld [vmem:[#allocation5 + $0x3f4] ss:$24 sps:$4 sm:$0xff]  }
  0x44   :  { %1932 = vmatprep.subr.bf16.mxu1 %v4154_v6  ;;  %v4163_v11 = vld [vmem:[#allocation5 + $0xc4] ss:$24 sps:$4 sm:$0xff]   ;;  %v4162_v12 = vld [vmem:[#allocation5 + $0x3f0] ss:$24 sps:$4 sm:$0xff]   ;;  %v4165_v14 = vld [vmem:[#allocation5 + $0xc0] ss:$24 sps:$4 sm:$0xff]  }
  0x45   :  { %v4166_v13 = vld [vmem:[#allocation5 + $0x3c4] ss:$24 sps:$4 sm:$0xff]   ;;  %v4169_v15 = vld [vmem:[#allocation5 + $0x94] ss:$24 sps:$4 sm:$0xff]   ;;  %v4168_v16 = vld [vmem:[#allocation5 + $0x3c0] ss:$24 sps:$4 sm:$0xff]  }
  0x46   :  { %1892 = vmatpush1.bf16.msra.mxu0 %v4153_v5  ;;  %v4172_v17 = vld [vmem:[#allocation5 + $0x394] ss:$24 sps:$4 sm:$0xff]   ;;  %v4171_v18 = vld [vmem:[#allocation5 + $0x90] ss:$24 sps:$4 sm:$0xff]   ;;  %v4175_v19 = vld [vmem:[#allocation5 + $0x64] ss:$24 sps:$4 sm:$0xff]  }
  0x47   :  { %1893 = vmatprep.subr.bf16.mxu0 %v4157_v8  ;;  %1933 = vmatpush1.bf16.msra.mxu1 %v4156_v7  ;;  %v4174_v20 = vld [vmem:[#allocation5 + $0x390] ss:$24 sps:$4 sm:$0xff]   ;;  %v4178_v21 = vld [vmem:[#allocation5 + $0x364] ss:$24 sps:$4 sm:$0xff]   ;;  %v4177_v22 = vld [vmem:[#allocation5 + $0x60] ss:$24 sps:$4 sm:$0xff]  }
  0x48   :  { %1934 = vmatprep.subr.bf16.mxu1 %v4160_v10  ;;  %v4181_v23 = vld [vmem:[#allocation5 + $0x34] ss:$24 sps:$4 sm:$0xff]   ;;  %v4180_v24 = vld [vmem:[#allocation5 + $0x360] ss:$24 sps:$4 sm:$0xff]   ;;  %v4183_v26 = vld [vmem:[#allocation5 + $0x30] ss:$24 sps:$4 sm:$0xff]  }
  0x49   :  { %v4184_v25 = vld [vmem:[#allocation5 + $0x334] ss:$24 sps:$4 sm:$0xff]   ;;  %v4187_v27 = vld [vmem:[#allocation5 + $0x4] ss:$24 sps:$4 sm:$0xff]   ;;  %v4186_v28 = vld [vmem:[#allocation5 + $0x330] ss:$24 sps:$4 sm:$0xff]  }
  0x4a   :  { %1894 = vmatpush1.bf16.msra.mxu0 %v4159_v9  ;;  %v4190_v29 = vld [vmem:[#allocation5 + $0x304] ss:$24 sps:$4 sm:$0xff]   ;;  %v4189_v30 = vld [vmem:[#allocation5] ss:$24 sps:$4 sm:$0xff]   ;;  %v4193_v31 = vld [vmem:[#allocation5 + $0x2d4] ss:$24 sps:$4 sm:$0xff]  }
  0x4b   :  { %1895 = vmatprep.subr.bf16.mxu0 %v4163_v11  ;;  %1935 = vmatpush1.bf16.msra.mxu1 %v4162_v12  ;;  %v4192_v32 = vld [vmem:[#allocation5 + $0x300] ss:$24 sps:$4 sm:$0xff]   ;;  %v4196_v33 = vld [vmem:[#allocation5 + $0x5d4] ss:$24 sps:$4 sm:$0xff]   ;;  %v4195_v34 = vld [vmem:[#allocation5 + $0x2d0] ss:$24 sps:$4 sm:$0xff]  }
  0x4c   :  { %1936 = vmatprep.subr.bf16.mxu1 %v4166_v13  ;;  %v4928_v36 = vmov 1983009808   ;;  %v4199_v38 = vld [vmem:[#allocation5 + $0x2a4] ss:$24 sps:$4 sm:$0xff]   ;;  %v4198_v39 = vld [vmem:[#allocation5 + $0x5d0] ss:$24 sps:$4 sm:$0xff]  }
  0x4d   :  { %v420_v37 = vunpack.c.l.s4 %v4928_v36  ;;  %v4202_v40 = vld [vmem:[#allocation5 + $0x5a4] ss:$24 sps:$4 sm:$0xff]   ;;  %v4201_v41 = vld [vmem:[#allocation5 + $0x2a0] ss:$24 sps:$4 sm:$0xff]   ;;  %v4977_v42 = vshrl.u32 %v386_v35, 7  ;;  %vm2995_vm0 = vcmask 1043456  }
  0x4e   :  { %1896 = vmatpush1.bf16.msra.mxu0 %v4165_v14  ;;  %v4205_v44 = vld [vmem:[#allocation5 + $0x274] ss:$24 sps:$4 sm:$0xff]   ;;  %v4204_v45 = vld [vmem:[#allocation5 + $0x5a0] ss:$24 sps:$4 sm:$0xff]   ;;  %v4207_v47 = vld [vmem:[#allocation5 + $0x270] ss:$24 sps:$4 sm:$0xff]  }
  0x4f   :  { %1897 = vmatprep.subr.bf16.mxu0 %v4169_v15  ;;  %1937 = vmatpush1.bf16.msra.mxu1 %v4168_v16  ;;  %v421_v43 = vunpack.c.0.s8 %v420_v37  ;;  %v4208_v46 = vld [vmem:[#allocation5 + $0x574] ss:$24 sps:$4 sm:$0xff]   ;;  %v4211_v49 = vld [vmem:[#allocation5 + $0x244] ss:$24 sps:$4 sm:$0xff]   ;;  %v4210_v50 = vld [vmem:[#allocation5 + $0x570] ss:$24 sps:$4 sm:$0xff]  }
  0x50   :  { %1938 = vmatprep.subr.bf16.mxu1 %v4172_v17  ;;  %v4214_v51 = vld [vmem:[#allocation5 + $0x544] ss:$24 sps:$4 sm:$0xff]   ;;  %v95_v52 = vld [vmem:[#allocation2] sm:$0xff]  ;;  %v4219_v61 = vld [vmem:[#allocation5 + $0x210] ss:$24 sps:$4 sm:$0xff]   ;;  %s4930_s2 = smov [#allocation11]  }
  0x51   :  { %v424_v48 = vsub.s32 %v421_v43, %v4977_v42  ;;  %v4213_v53 = vld [vmem:[#allocation5 + $0x240] ss:$24 sps:$4 sm:$0xff]   ;;  %v418_v55 = vcombine.high %v95_v52, %v95_v52  ;;  %v4217_v56 = vld [vmem:[#allocation5 + $0x214] ss:$24 sps:$4 sm:$0xff]   ;;  %v4223_v63 = vld [vmem:[#allocation5 + $0x1e4] ss:$24 sps:$4 sm:$0xff]  }
  0x52   :  { %1898 = vmatpush1.bf16.msra.mxu0 %v4171_v18  ;;  %v4216_v57 = vld [vmem:[#allocation5 + $0x540] ss:$24 sps:$4 sm:$0xff]   ;;  %v4220_v60 = vld [vmem:[#allocation5 + $0x514] ss:$24 sps:$4 sm:$0xff]   ;;  %v4222_v0 = vld [vmem:[#allocation5 + $0x510] ss:$24 sps:$4 sm:$0xff]  }
  0x53   :  { %1899 = vmatprep.subr.bf16.mxu0 %v4175_v19  ;;  %1939 = vmatpush1.bf16.msra.mxu1 %v4174_v20  ;;  %v4980_v54 = vrot.slane %v95_v52, %v424_v48  ;;  %v4986_v59 = vrot.slane %v418_v55, %v424_v48  ;;  %v4226_v1 = vld [vmem:[#allocation5 + $0x4e4] ss:$24 sps:$4 sm:$0xff]   ;;  %v4225_v2 = vld [vmem:[#allocation5 + $0x1e0] ss:$24 sps:$4 sm:$0xff]   ;;  %v4229_v3 = vld [vmem:[#allocation5 + $0x1b4] ss:$24 sps:$4 sm:$0xff]  }
  0x54   :  { %1940 = vmatprep.subr.bf16.mxu1 %v4178_v21  ;;  %v4228_v4 = vld [vmem:[#allocation5 + $0x4e0] ss:$24 sps:$4 sm:$0xff]   ;;  %v4232_v5 = vld [vmem:[#allocation5 + $0x4b4] ss:$24 sps:$4 sm:$0xff]   ;;  %v4231_v6 = vld [vmem:[#allocation5 + $0x1b0] ss:$24 sps:$4 sm:$0xff]  }
  0x55   :  { %v4984_v58 = vcombine.high %v4980_v54, %v4980_v54  ;;  %v4991_v62 = vcombine.high %v4986_v59, %v4986_v59  ;;  %v4235_v7 = vld [vmem:[#allocation5 + $0x184] ss:$24 sps:$4 sm:$0xff]   ;;  %v4234_v8 = vld [vmem:[#allocation5 + $0x4b0] ss:$24 sps:$4 sm:$0xff]   ;;  %v4237_v10 = vld [vmem:[#allocation5 + $0x180] ss:$24 sps:$4 sm:$0xff]  }
  0x56   :  { %1900 = vmatpush1.bf16.msra.mxu0 %v4177_v22  ;;  %v4238_v9 = vld [vmem:[#allocation5 + $0x484] ss:$24 sps:$4 sm:$0xff]   ;;  %v4243_v11 = vld [vmem:[#allocation5 + $0x754] ss:$24 sps:$4 sm:$0xff]   ;;  %v4240_v12 = vld [vmem:[#allocation5 + $0x480] ss:$24 sps:$4 sm:$0xff]  }
  0x57   :  { %1901 = vmatprep.subr.bf16.mxu0 %v4181_v23  ;;  %1941 = vmatpush1.bf16.msra.mxu1 %v4180_v24  ;;  %v4247_v13 = vld [vmem:[#allocation5 + $0x15c] ss:$24 sps:$4 sm:$0xff]   ;;  %v4241_v14 = vld [vmem:[#allocation5 + $0x750] ss:$24 sps:$4 sm:$0xff]   ;;  %v4253_v17 = vld [vmem:[#allocation5 + $0x12c] ss:$24 sps:$4 sm:$0xff]  }
  0x58   :  { %1942 = vmatprep.subr.bf16.mxu1 %v4184_v25  ;;  %1921 = vmatprep.mubr.bf16.mxu0 %v4984_v58  ;;  %v4250_v15 = vld [vmem:[#allocation5 + $0x724] ss:$24 sps:$4 sm:$0xff]   ;;  %v4245_v16 = vld [vmem:[#allocation5 + $0x158] ss:$24 sps:$4 sm:$0xff]   ;;  %v4256_v19 = vld [vmem:[#allocation5 + $0x6f4] ss:$24 sps:$4 sm:$0xff]  }
  0x59   :  { %1962 = vmatprep.mubr.bf16.mxu1 %v4991_v62  ;;  %v4248_v18 = vld [vmem:[#allocation5 + $0x720] ss:$24 sps:$4 sm:$0xff]   ;;  %v4259_v21 = vld [vmem:[#allocation5 + $0xfc] ss:$24 sps:$4 sm:$0xff]   ;;  %v4254_v22 = vld [vmem:[#allocation5 + $0x6f0] ss:$24 sps:$4 sm:$0xff]  }
  0x5a   :  { %1902 = vmatpush1.bf16.msra.mxu0 %v4183_v26  ;;  %v4251_v20 = vld [vmem:[#allocation5 + $0x128] ss:$24 sps:$4 sm:$0xff]   ;;  %v4262_v23 = vld [vmem:[#allocation5 + $0x6c4] ss:$24 sps:$4 sm:$0xff]   ;;  %v4257_v24 = vld [vmem:[#allocation5 + $0xf8] ss:$24 sps:$4 sm:$0xff]  }
  0x5b   :  { %1903 = vmatprep.subr.bf16.mxu0 %v4187_v27  ;;  %1943 = vmatpush1.bf16.msra.mxu1 %v4186_v28  ;;  %v4265_v25 = vld [vmem:[#allocation5 + $0xcc] ss:$24 sps:$4 sm:$0xff]   ;;  %v4260_v26 = vld [vmem:[#allocation5 + $0x6c0] ss:$24 sps:$4 sm:$0xff]   ;;  %s3619_s4 = sshll.u32 %s4930_s2, 4  ;;  %s3620_s4 = int_to_ptr.vmem [resolvable:$true] %s3619_s4 }
  0x5c   :  { %1944 = vmatprep.subr.bf16.mxu1 %v4190_v29  ;;  %v4268_v27 = vld [vmem:[#allocation5 + $0x694] ss:$24 sps:$4 sm:$0xff]   ;;  %v4263_v28 = vld [vmem:[#allocation5 + $0xc8] ss:$24 sps:$4 sm:$0xff]   ;;  %v4286_v43 = vld [vmem:[#allocation5 + $0x604] ss:$24 sps:$4 sm:$0xff]   ;;  %p4894_p12 = scmp.lt.s32.totalorder %s3620_s4, %s3620_s4 }
  0x5d   :  { %v4271_v29 = vld [vmem:[#allocation5 + $0x9c] ss:$24 sps:$4 sm:$0xff]   ;;  %v4275_v37 = vld [vmem:[#allocation5 + $0x68] ss:$24 sps:$4 sm:$0xff]   ;;  %v4293_v52 = vld [vmem:[#allocation5 + $0x2d8] ss:$24 sps:$4 sm:$0xff]  }
  0x5e   :  { %1904 = vmatpush1.bf16.msra.mxu0 %v4189_v30  ;;  %v4266_v30 = vld [vmem:[#allocation5 + $0x690] ss:$24 sps:$4 sm:$0xff]   ;;  %v4280_v36 = vld [vmem:[#allocation5 + $0x634] ss:$24 sps:$4 sm:$0xff]   ;;  %v4296_v55 = vld [vmem:[#allocation5 + $0x8a0] ss:$24 sps:$4 sm:$0xff]  }
  0x5f   :  { %1905 = vmatprep.subr.bf16.mxu0 %v4193_v31  ;;  %1945 = vmatpush1.bf16.msra.mxu1 %v4192_v32  ;;  %v4274_v31 = vld [vmem:[#allocation5 + $0x664] ss:$24 sps:$4 sm:$0xff]   ;;  %v4269_v32 = vld [vmem:[#allocation5 + $0x98] ss:$24 sps:$4 sm:$0xff]   ;;  %v4287_v48 = vld [vmem:[#allocation5 + $0x8] ss:$24 sps:$4 sm:$0xff]  }
  0x60   :  { %1946 = vmatprep.subr.bf16.mxu1 %v4196_v33  ;;  %v4277_v33 = vld [vmem:[#allocation5 + $0x6c] ss:$24 sps:$4 sm:$0xff]   ;;  %s4889_s21 = scalar_lea.vmem %s3620_s4, 32 }
  0x61   :  { %p4890_p11 = scmp.ne.s32.totalorder %s3620_s4, %s4889_s21  ;;  %p4895_p13 = scmp.lt.s32.totalorder %s4889_s21, %s4889_s21 }
  0x62   :  { %1906 = vmatpush2.bf16.msra.mxu0 %v4195_v34  ;;  %v4272_v34 = vld [vmem:[#allocation5 + $0x660] ss:$24 sps:$4 sm:$0xff]  }
  0x63   :  { %1907 = vmatprep.subr.bf16.mxu0 %v4199_v38  ;;  %1947 = vmatpush2.bf16.msra.mxu1 %v4198_v39  ;;  %v4283_v38 = vld [vmem:[#allocation5 + $0x3c] ss:$24 sps:$4 sm:$0xff]   ;;  %p4896_p0 = por %p4895_p13, %p4894_p12 }
  0x64   :  { %1948 = vmatprep.subr.bf16.mxu1 %v4202_v40  ;;  %v4997_v39 = vld.sshfl [vmem:[#allocation2 + $0x8] sm:$0x33 pattern:$0x76325410]  ;;  %v4278_v40 = vld [vmem:[#allocation5 + $0x630] ss:$24 sps:$4 sm:$0xff]  }
  0x65   :  { %p4897_p1 = pnand %p4896_p0, %p4890_p11 }
  0x66   :  { %1908 = vmatpush2.bf16.msra.mxu0 %v4201_v41  ;;  %v5001_v41 = vcombine.high %v4997_v39, %v4997_v39 }
  0x67   :  { %1909 = vmatprep.subr.bf16.mxu0 %v4205_v44  ;;  %1949 = vmatpush2.bf16.msra.mxu1 %v4204_v45  ;;  %v4281_v44 = vld [vmem:[#allocation5 + $0x38] ss:$24 sps:$4 sm:$0xff]   ;;  %v4289_v45 = vld [vmem:[#allocation5 + $0xc] ss:$24 sps:$4 sm:$0xff]  }
  0x68   :  { %1950 = vmatprep.subr.bf16.mxu1 %v4208_v46  ;;  %v4284_v46 = vld [vmem:[#allocation5 + $0x600] ss:$24 sps:$4 sm:$0xff]  }
  0x6a   :  { %1910 = vmatpush2.bf16.msra.mxu0 %v4207_v47  ;;  %v4292_v47 = vld [vmem:[#allocation5 + $0x8d4] ss:$24 sps:$4 sm:$0xff]  }
  0x6b   :  { %1911 = vmatprep.subr.bf16.mxu0 %v4211_v49  ;;  %1951 = vmatpush2.bf16.msra.mxu1 %v4210_v50  ;;  %v4295_v49 = vld [vmem:[#allocation5 + $0x2dc] ss:$24 sps:$4 sm:$0xff]   ;;  %v4290_v50 = vld [vmem:[#allocation5 + $0x8d0] ss:$24 sps:$4 sm:$0xff]  }
  0x6c   :  { %1952 = vmatprep.subr.bf16.mxu1 %v4214_v51  ;;  %v4298_v51 = vld [vmem:[#allocation5 + $0x8a4] ss:$24 sps:$4 sm:$0xff]  }
  0x6e   :  { %1912 = vmatpush2.bf16.msra.mxu0 %v4213_v53  ;;  %v4301_v53 = vld [vmem:[#allocation5 + $0x2ac] ss:$24 sps:$4 sm:$0xff]  }
  0x6f   :  { %1913 = vmatprep.subr.bf16.mxu0 %v4217_v56  ;;  %1953 = vmatpush2.bf16.msra.mxu1 %v4216_v57  ;;  %v4304_v56 = vld [vmem:[#allocation5 + $0x874] ss:$24 sps:$4 sm:$0xff]   ;;  %v4299_v57 = vld [vmem:[#allocation5 + $0x2a8] ss:$24 sps:$4 sm:$0xff]  }
  0x70   :  { %1954 = vmatprep.subr.bf16.mxu1 %v4220_v60  ;;  %v4307_v60 = vld [vmem:[#allocation5 + $0x27c] ss:$24 sps:$4 sm:$0xff]  }
  0x72   :  { %1914 = vmatpush2.bf16.msra.mxu0 %v4219_v61  ;;  %v4302_v61 = vld [vmem:[#allocation5 + $0x870] ss:$24 sps:$4 sm:$0xff]  }
  0x73   :  { %1915 = vmatprep.subr.bf16.mxu0 %v4223_v63  ;;  %1955 = vmatpush2.bf16.msra.mxu1 %v4222_v0  ;;  %v4310_v63 = vld [vmem:[#allocation5 + $0x844] ss:$24 sps:$4 sm:$0xff]   ;;  %v4305_v0 = vld [vmem:[#allocation5 + $0x278] ss:$24 sps:$4 sm:$0xff]  }
  0x74   :  { %1956 = vmatprep.subr.bf16.mxu1 %v4226_v1  ;;  %v4313_v1 = vld [vmem:[#allocation5 + $0x24c] ss:$24 sps:$4 sm:$0xff]  }
  0x76   :  { %1916 = vmatpush2.bf16.msra.mxu0 %v4225_v2  ;;  %v4308_v2 = vld [vmem:[#allocation5 + $0x840] ss:$24 sps:$4 sm:$0xff]  }
  0x77   :  { %1917 = vmatprep.subr.bf16.mxu0 %v4229_v3  ;;  %1957 = vmatpush2.bf16.msra.mxu1 %v4228_v4  ;;  %v4316_v3 = vld [vmem:[#allocation5 + $0x814] ss:$24 sps:$4 sm:$0xff]   ;;  %v4311_v4 = vld [vmem:[#allocation5 + $0x248] ss:$24 sps:$4 sm:$0xff]  }
  0x78   :  { %1958 = vmatprep.subr.bf16.mxu1 %v4232_v5  ;;  %v4319_v5 = vld [vmem:[#allocation5 + $0x21c] ss:$24 sps:$4 sm:$0xff]  }
  0x7a   :  { %1918 = vmatpush2.bf16.msra.mxu0 %v4231_v6  ;;  %v4314_v6 = vld [vmem:[#allocation5 + $0x810] ss:$24 sps:$4 sm:$0xff]  }
  0x7b   :  { %1919 = vmatprep.subr.bf16.mxu0 %v4235_v7  ;;  %1959 = vmatpush2.bf16.msra.mxu1 %v4234_v8  ;;  %v4322_v7 = vld [vmem:[#allocation5 + $0x7e4] ss:$24 sps:$4 sm:$0xff]   ;;  %v4317_v8 = vld [vmem:[#allocation5 + $0x218] ss:$24 sps:$4 sm:$0xff]  }
  0x7c   :  { %1960 = vmatprep.subr.bf16.mxu1 %v4238_v9  ;;  %v4325_v9 = vld [vmem:[#allocation5 + $0x1ec] ss:$24 sps:$4 sm:$0xff]  }
  0x7e   :  { %1920 = vmatpush2.bf16.msra.mxu0 %v4237_v10  ;;  %v4320_v10 = vld [vmem:[#allocation5 + $0x7e0] ss:$24 sps:$4 sm:$0xff]  }
  0x7f   :  { %1971 = vmatprep.subr.bf16.mxu0 %v4243_v11  ;;  %1961 = vmatpush2.bf16.msra.mxu1 %v4240_v12  ;;  %v4328_v11 = vld [vmem:[#allocation5 + $0x7b4] ss:$24 sps:$4 sm:$0xff]   ;;  %v4323_v12 = vld [vmem:[#allocation5 + $0x1e8] ss:$24 sps:$4 sm:$0xff]  }
  0x80   :  { %2012 = vmatprep.subr.bf16.mxu1 %v4247_v13  ;;  %v4331_v13 = vld [vmem:[#allocation5 + $0x1bc] ss:$24 sps:$4 sm:$0xff]  }
  0x81   :  { %1922 = vmatmul.mubr.bf16.vlgmr.msra.gmra.mxu0 %v4980_v54 }
  0x82   :  { %1972 = vmatpush1.bf16.msra.mxu0 %v4241_v14  ;;  %1963 = vmatmul.mubr.bf16.vlgmr.msra.gmra.mxu1 %v4986_v59  ;;  %v4326_v14 = vld [vmem:[#allocation5 + $0x7b0] ss:$24 sps:$4 sm:$0xff]  }
  0x83   :  { %1973 = vmatprep.subr.bf16.mxu0 %v4250_v15  ;;  %2013 = vmatpush1.bf16.msra.mxu1 %v4245_v16  ;;  %v4334_v15 = vld [vmem:[#allocation5 + $0x784] ss:$24 sps:$4 sm:$0xff]   ;;  %v4329_v16 = vld [vmem:[#allocation5 + $0x1b8] ss:$24 sps:$4 sm:$0xff]  }
  0x84   :  { %2044 = vmatprep.mubr.bf16.mxu1 %v4984_v58  ;;  %2014 = vmatprep.subr.bf16.mxu1 %v4253_v17  ;;  %v4337_v17 = vld [vmem:[#allocation5 + $0x18c] ss:$24 sps:$4 sm:$0xff]  }
  0x85   :  { %2003 = vmatprep.mubr.bf16.mxu0 %v5001_v41 }
  0x86   :  { %1974 = vmatpush1.bf16.msra.mxu0 %v4248_v18  ;;  %v4332_v18 = vld [vmem:[#allocation5 + $0x780] ss:$24 sps:$4 sm:$0xff]  }
  0x87   :  { %1975 = vmatprep.subr.bf16.mxu0 %v4256_v19  ;;  %2015 = vmatpush1.bf16.msra.mxu1 %v4251_v20  ;;  %v4340_v19 = vld [vmem:[#allocation5 + $0x45c] ss:$24 sps:$4 sm:$0xff]   ;;  %v4335_v20 = vld [vmem:[#allocation5 + $0x188] ss:$24 sps:$4 sm:$0xff]  }
  0x88   :  { %2016 = vmatprep.subr.bf16.mxu1 %v4259_v21  ;;  %v4343_v21 = vld [vmem:[#allocation5 + $0x75c] ss:$24 sps:$4 sm:$0xff]  }
  0x8a   :  { %1976 = vmatpush1.bf16.msra.mxu0 %v4254_v22  ;;  %v4338_v22 = vld [vmem:[#allocation5 + $0x458] ss:$24 sps:$4 sm:$0xff]  }
  0x8b   :  { %1977 = vmatprep.subr.bf16.mxu0 %v4262_v23  ;;  %2017 = vmatpush1.bf16.msra.mxu1 %v4257_v24  ;;  %v4346_v23 = vld [vmem:[#allocation5 + $0x42c] ss:$24 sps:$4 sm:$0xff]   ;;  %v4341_v24 = vld [vmem:[#allocation5 + $0x758] ss:$24 sps:$4 sm:$0xff]  }
  0x8c   :  { %2018 = vmatprep.subr.bf16.mxu1 %v4265_v25  ;;  %v4349_v25 = vld [vmem:[#allocation5 + $0x72c] ss:$24 sps:$4 sm:$0xff]  }
  0x8e   :  { %1978 = vmatpush1.bf16.msra.mxu0 %v4260_v26  ;;  %v4344_v26 = vld [vmem:[#allocation5 + $0x428] ss:$24 sps:$4 sm:$0xff]  }
  0x8f   :  { %1979 = vmatprep.subr.bf16.mxu0 %v4268_v27  ;;  %2019 = vmatpush1.bf16.msra.mxu1 %v4263_v28  ;;  %v4352_v27 = vld [vmem:[#allocation5 + $0x3fc] ss:$24 sps:$4 sm:$0xff]   ;;  %v4347_v28 = vld [vmem:[#allocation5 + $0x728] ss:$24 sps:$4 sm:$0xff]  }
  0x90   :  { %2020 = vmatprep.subr.bf16.mxu1 %v4271_v29  ;;  %v4355_v29 = vld [vmem:[#allocation5 + $0x6fc] ss:$24 sps:$4 sm:$0xff]  }
  0x92   :  { %1980 = vmatpush1.bf16.msra.mxu0 %v4266_v30  ;;  %v4350_v30 = vld [vmem:[#allocation5 + $0x3f8] ss:$24 sps:$4 sm:$0xff]  }
  0x93   :  { %1981 = vmatprep.subr.bf16.mxu0 %v4274_v31  ;;  %2021 = vmatpush1.bf16.msra.mxu1 %v4269_v32  ;;  %v4358_v31 = vld [vmem:[#allocation5 + $0x3cc] ss:$24 sps:$4 sm:$0xff]   ;;  %v4353_v32 = vld [vmem:[#allocation5 + $0x6f8] ss:$24 sps:$4 sm:$0xff]  }
  0x94   :  { %2022 = vmatprep.subr.bf16.mxu1 %v4277_v33  ;;  %v4361_v33 = vld [vmem:[#allocation5 + $0x6cc] ss:$24 sps:$4 sm:$0xff]  }
  0x96   :  { %1982 = vmatpush1.bf16.msra.mxu0 %v4272_v34  ;;  %v4356_v34 = vld [vmem:[#allocation5 + $0x3c8] ss:$24 sps:$4 sm:$0xff]  }
  0x97   :  { %1983 = vmatprep.subr.bf16.mxu0 %v4280_v36  ;;  %2023 = vmatpush1.bf16.msra.mxu1 %v4275_v37  ;;  %v4364_v36 = vld [vmem:[#allocation5 + $0x39c] ss:$24 sps:$4 sm:$0xff]   ;;  %v4359_v37 = vld [vmem:[#allocation5 + $0x6c8] ss:$24 sps:$4 sm:$0xff]  }
  0x98   :  { %2024 = vmatprep.subr.bf16.mxu1 %v4283_v38  ;;  %v4367_v38 = vld [vmem:[#allocation5 + $0x69c] ss:$24 sps:$4 sm:$0xff]  }
  0x9a   :  { %1984 = vmatpush1.bf16.msra.mxu0 %v4278_v40  ;;  %v4362_v40 = vld [vmem:[#allocation5 + $0x398] ss:$24 sps:$4 sm:$0xff]  }
  0x9b   :  { %1985 = vmatprep.subr.bf16.mxu0 %v4286_v43  ;;  %2025 = vmatpush1.bf16.msra.mxu1 %v4281_v44  ;;  %v4370_v43 = vld [vmem:[#allocation5 + $0x36c] ss:$24 sps:$4 sm:$0xff]   ;;  %v4365_v44 = vld [vmem:[#allocation5 + $0x698] ss:$24 sps:$4 sm:$0xff]  }
  0x9c   :  { %2026 = vmatprep.subr.bf16.mxu1 %v4289_v45  ;;  %v4373_v45 = vld [vmem:[#allocation5 + $0x66c] ss:$24 sps:$4 sm:$0xff]  }
  0x9e   :  { %1986 = vmatpush1.bf16.msra.mxu0 %v4284_v46  ;;  %v4368_v46 = vld [vmem:[#allocation5 + $0x368] ss:$24 sps:$4 sm:$0xff]  }
  0x9f   :  { %1987 = vmatprep.subr.bf16.mxu0 %v4292_v47  ;;  %2027 = vmatpush1.bf16.msra.mxu1 %v4287_v48  ;;  %v4376_v47 = vld [vmem:[#allocation5 + $0x33c] ss:$24 sps:$4 sm:$0xff]   ;;  %v4371_v48 = vld [vmem:[#allocation5 + $0x668] ss:$24 sps:$4 sm:$0xff]  }
  0xa0   :  { %2028 = vmatprep.subr.bf16.mxu1 %v4295_v49  ;;  %v4379_v49 = vld [vmem:[#allocation5 + $0x63c] ss:$24 sps:$4 sm:$0xff]  }
  0xa2   :  { %1988 = vmatpush2.bf16.msra.mxu0 %v4290_v50  ;;  %v4374_v50 = vld [vmem:[#allocation5 + $0x338] ss:$24 sps:$4 sm:$0xff]  }
  0xa3   :  { %1989 = vmatprep.subr.bf16.mxu0 %v4298_v51  ;;  %2029 = vmatpush2.bf16.msra.mxu1 %v4293_v52  ;;  %v4382_v51 = vld [vmem:[#allocation5 + $0x30c] ss:$24 sps:$4 sm:$0xff]   ;;  %v4377_v52 = vld [vmem:[#allocation5 + $0x638] ss:$24 sps:$4 sm:$0xff]  }
  0xa4   :  { %2030 = vmatprep.subr.bf16.mxu1 %v4301_v53  ;;  %v4385_v53 = vld [vmem:[#allocation5 + $0x60c] ss:$24 sps:$4 sm:$0xff]  }
  0xa6   :  { %1990 = vmatpush2.bf16.msra.mxu0 %v4296_v55  ;;  %v4380_v55 = vld [vmem:[#allocation5 + $0x308] ss:$24 sps:$4 sm:$0xff]  }
  0xa7   :  { %1991 = vmatprep.subr.bf16.mxu0 %v4304_v56  ;;  %2031 = vmatpush2.bf16.msra.mxu1 %v4299_v57  ;;  %v4388_v56 = vld [vmem:[#allocation5 + $0x5dc] ss:$24 sps:$4 sm:$0xff]   ;;  %v4383_v57 = vld [vmem:[#allocation5 + $0x608] ss:$24 sps:$4 sm:$0xff]  }
  0xa8   :  { %2032 = vmatprep.subr.bf16.mxu1 %v4307_v60  ;;  %v4391_v60 = vld [vmem:[#allocation5 + $0x8dc] ss:$24 sps:$4 sm:$0xff]  }
  0xaa   :  { %1992 = vmatpush2.bf16.msra.mxu0 %v4302_v61  ;;  %v4386_v61 = vld [vmem:[#allocation5 + $0x5d8] ss:$24 sps:$4 sm:$0xff]  }
  0xab   :  { %1993 = vmatprep.subr.bf16.mxu0 %v4310_v63  ;;  %2033 = vmatpush2.bf16.msra.mxu1 %v4305_v0  ;;  %v4394_v63 = vld [vmem:[#allocation5 + $0x5ac] ss:$24 sps:$4 sm:$0xff]   ;;  %v4389_v0 = vld [vmem:[#allocation5 + $0x8d8] ss:$24 sps:$4 sm:$0xff]  }
  0xac   :  { %2034 = vmatprep.subr.bf16.mxu1 %v4313_v1  ;;  %v4397_v1 = vld [vmem:[#allocation5 + $0x8ac] ss:$24 sps:$4 sm:$0xff]  }
  0xae   :  { %1994 = vmatpush2.bf16.msra.mxu0 %v4308_v2  ;;  %v4392_v2 = vld [vmem:[#allocation5 + $0x5a8] ss:$24 sps:$4 sm:$0xff]  }
  0xaf   :  { %1995 = vmatprep.subr.bf16.mxu0 %v4316_v3  ;;  %2035 = vmatpush2.bf16.msra.mxu1 %v4311_v4  ;;  %v4400_v3 = vld [vmem:[#allocation5 + $0x57c] ss:$24 sps:$4 sm:$0xff]   ;;  %v4395_v4 = vld [vmem:[#allocation5 + $0x8a8] ss:$24 sps:$4 sm:$0xff]  }
  0xb0   :  { %2036 = vmatprep.subr.bf16.mxu1 %v4319_v5  ;;  %v4403_v5 = vld [vmem:[#allocation5 + $0x87c] ss:$24 sps:$4 sm:$0xff]  }
  0xb2   :  { %1996 = vmatpush2.bf16.msra.mxu0 %v4314_v6  ;;  %v4398_v6 = vld [vmem:[#allocation5 + $0x578] ss:$24 sps:$4 sm:$0xff]  }
  0xb3   :  { %1997 = vmatprep.subr.bf16.mxu0 %v4322_v7  ;;  %2037 = vmatpush2.bf16.msra.mxu1 %v4317_v8  ;;  %v4406_v7 = vld [vmem:[#allocation5 + $0x54c] ss:$24 sps:$4 sm:$0xff]   ;;  %v4401_v8 = vld [vmem:[#allocation5 + $0x878] ss:$24 sps:$4 sm:$0xff]  }
  0xb4   :  { %2038 = vmatprep.subr.bf16.mxu1 %v4325_v9  ;;  %v4409_v9 = vld [vmem:[#allocation5 + $0x84c] ss:$24 sps:$4 sm:$0xff]  }
  0xb6   :  { %1998 = vmatpush2.bf16.msra.mxu0 %v4320_v10  ;;  %v4404_v10 = vld [vmem:[#allocation5 + $0x548] ss:$24 sps:$4 sm:$0xff]  }
  0xb7   :  { %1999 = vmatprep.subr.bf16.mxu0 %v4328_v11  ;;  %2039 = vmatpush2.bf16.msra.mxu1 %v4323_v12  ;;  %v4412_v11 = vld [vmem:[#allocation5 + $0x51c] ss:$24 sps:$4 sm:$0xff]   ;;  %v4407_v12 = vld [vmem:[#allocation5 + $0x848] ss:$24 sps:$4 sm:$0xff]  }
  0xb8   :  { %2040 = vmatprep.subr.bf16.mxu1 %v4331_v13  ;;  %v4415_v13 = vld [vmem:[#allocation5 + $0x81c] ss:$24 sps:$4 sm:$0xff]  }
  0xba   :  { %2000 = vmatpush2.bf16.msra.mxu0 %v4326_v14  ;;  %v4410_v14 = vld [vmem:[#allocation5 + $0x518] ss:$24 sps:$4 sm:$0xff]  }
  0xbb   :  { %2001 = vmatprep.subr.bf16.mxu0 %v4334_v15  ;;  %2041 = vmatpush2.bf16.msra.mxu1 %v4329_v16  ;;  %v4418_v15 = vld [vmem:[#allocation5 + $0x4ec] ss:$24 sps:$4 sm:$0xff]   ;;  %v4413_v16 = vld [vmem:[#allocation5 + $0x818] ss:$24 sps:$4 sm:$0xff]  }
  0xbc   :  { %2042 = vmatprep.subr.bf16.mxu1 %v4337_v17  ;;  %v4421_v17 = vld [vmem:[#allocation5 + $0x7ec] ss:$24 sps:$4 sm:$0xff]  }
  0xbe   :  { %2002 = vmatpush2.bf16.msra.mxu0 %v4332_v18  ;;  %v4416_v18 = vld [vmem:[#allocation5 + $0x4e8] ss:$24 sps:$4 sm:$0xff]  }
  0xbf   :  { %2053 = vmatprep.subr.bf16.mxu0 %v4340_v19  ;;  %2043 = vmatpush2.bf16.msra.mxu1 %v4335_v20  ;;  %v4424_v19 = vld [vmem:[#allocation5 + $0x4bc] ss:$24 sps:$4 sm:$0xff]   ;;  %v4419_v20 = vld [vmem:[#allocation5 + $0x7e8] ss:$24 sps:$4 sm:$0xff]  }
  0xc0   :  { %2094 = vmatprep.subr.bf16.mxu1 %v4343_v21  ;;  %v4427_v21 = vld [vmem:[#allocation5 + $0x7bc] ss:$24 sps:$4 sm:$0xff]  }
  0xc1   :  { %2004 = vmatmul.mubr.bf16.vlgmr.msra.gmra.mxu0 %v4997_v39 }
  0xc2   :  { %2054 = vmatpush1.bf16.msra.mxu0 %v4338_v22  ;;  %2085 = vmatprep.mubr.bf16.mxu0 %v4991_v62  ;;  %v4422_v22 = vld [vmem:[#allocation5 + $0x4b8] ss:$24 sps:$4 sm:$0xff]  }
  0xc3   :  { %2045 = vmatmul.mubr.bf16.vlgmr.msra.gmra.mxu1 %v4980_v54  ;;  %2055 = vmatprep.subr.bf16.mxu0 %v4346_v23  ;;  %v4430_v23 = vld [vmem:[#allocation5 + $0x48c] ss:$24 sps:$4 sm:$0xff]  }
  0xc4   :  { %2095 = vmatpush1.bf16.msra.mxu1 %v4341_v24  ;;  %2126 = vmatprep.mubr.bf16.mxu1 %v5001_v41  ;;  %v4425_v24 = vld [vmem:[#allocation5 + $0x7b8] ss:$24 sps:$4 sm:$0xff]  }
  0xc5   :  { %2096 = vmatprep.subr.bf16.mxu1 %v4349_v25  ;;  %v4433_v25 = vld [vmem:[#allocation5 + $0x78c] ss:$24 sps:$4 sm:$0xff]  }
  0xc6   :  { %2056 = vmatpush1.bf16.msra.mxu0 %v4344_v26  ;;  %v4428_v26 = vld [vmem:[#allocation5 + $0x488] ss:$24 sps:$4 sm:$0xff]  }
  0xc7   :  { %2057 = vmatprep.subr.bf16.mxu0 %v4352_v27  ;;  %v4436_v27 = vld [vmem:[#allocation5 + $0x164] ss:$24 sps:$4 sm:$0xff]  }
  0xc8   :  { %2097 = vmatpush1.bf16.msra.mxu1 %v4347_v28  ;;  %v4431_v28 = vld [vmem:[#allocation5 + $0x788] ss:$24 sps:$4 sm:$0xff]  }
  0xc9   :  { %2098 = vmatprep.subr.bf16.mxu1 %v4355_v29  ;;  %v4439_v29 = vld [vmem:[#allocation5 + $0x464] ss:$24 sps:$4 sm:$0xff]  }
  0xca   :  { %2058 = vmatpush1.bf16.msra.mxu0 %v4350_v30  ;;  %v4434_v30 = vld [vmem:[#allocation5 + $0x160] ss:$24 sps:$4 sm:$0xff]  }
  0xcb   :  { %2059 = vmatprep.subr.bf16.mxu0 %v4358_v31  ;;  %v4442_v31 = vld [vmem:[#allocation5 + $0x134] ss:$24 sps:$4 sm:$0xff]  }
  0xcc   :  { %2099 = vmatpush1.bf16.msra.mxu1 %v4353_v32  ;;  %v4437_v32 = vld [vmem:[#allocation5 + $0x460] ss:$24 sps:$4 sm:$0xff]  }
  0xcd   :  { %2100 = vmatprep.subr.bf16.mxu1 %v4361_v33  ;;  %v4445_v33 = vld [vmem:[#allocation5 + $0x434] ss:$24 sps:$4 sm:$0xff]  }
  0xce   :  { %2060 = vmatpush1.bf16.msra.mxu0 %v4356_v34  ;;  %v4440_v34 = vld [vmem:[#allocation5 + $0x130] ss:$24 sps:$4 sm:$0xff]  }
  0xcf   :  { %2061 = vmatprep.subr.bf16.mxu0 %v4364_v36  ;;  %v4448_v36 = vld [vmem:[#allocation5 + $0x104] ss:$24 sps:$4 sm:$0xff]  }
  0xd0   :  { %2101 = vmatpush1.bf16.msra.mxu1 %v4359_v37  ;;  %v4443_v37 = vld [vmem:[#allocation5 + $0x430] ss:$24 sps:$4 sm:$0xff]  }
  0xd1   :  { %2102 = vmatprep.subr.bf16.mxu1 %v4367_v38  ;;  %v4451_v38 = vld [vmem:[#allocation5 + $0x404] ss:$24 sps:$4 sm:$0xff]  }
  0xd2   :  { %2062 = vmatpush1.bf16.msra.mxu0 %v4362_v40  ;;  %v4446_v40 = vld [vmem:[#allocation5 + $0x100] ss:$24 sps:$4 sm:$0xff]  }
  0xd3   :  { %2063 = vmatprep.subr.bf16.mxu0 %v4370_v43  ;;  %v4454_v43 = vld [vmem:[#allocation5 + $0xd4] ss:$24 sps:$4 sm:$0xff]  }
  0xd4   :  { %2103 = vmatpush1.bf16.msra.mxu1 %v4365_v44  ;;  %v4449_v44 = vld [vmem:[#allocation5 + $0x400] ss:$24 sps:$4 sm:$0xff]  }
  0xd5   :  { %2104 = vmatprep.subr.bf16.mxu1 %v4373_v45  ;;  %v4457_v45 = vld [vmem:[#allocation5 + $0x3d4] ss:$24 sps:$4 sm:$0xff]  }
  0xd6   :  { %2064 = vmatpush1.bf16.msra.mxu0 %v4368_v46  ;;  %v4455_v46 = vld [vmem:[#allocation5 + $0x3d0] ss:$24 sps:$4 sm:$0xff]  }
  0xd7   :  { %2065 = vmatprep.subr.bf16.mxu0 %v4376_v47  ;;  %v4463_v47 = vld [vmem:[#allocation5 + $0x3a4] ss:$24 sps:$4 sm:$0xff]  }
  0xd8   :  { %2105 = vmatpush1.bf16.msra.mxu1 %v4371_v48  ;;  %v4466_v48 = vld [vmem:[#allocation5 + $0x74] ss:$24 sps:$4 sm:$0xff]  }
  0xd9   :  { %2106 = vmatprep.subr.bf16.mxu1 %v4379_v49  ;;  %v4461_v49 = vld [vmem:[#allocation5 + $0x3a0] ss:$24 sps:$4 sm:$0xff]  }
  0xda   :  { %2066 = vmatpush1.bf16.msra.mxu0 %v4374_v50  ;;  %v4469_v50 = vld [vmem:[#allocation5 + $0x374] ss:$24 sps:$4 sm:$0xff]  }
  0xdb   :  { %2067 = vmatprep.subr.bf16.mxu0 %v4382_v51  ;;  %v4464_v51 = vld [vmem:[#allocation5 + $0x70] ss:$24 sps:$4 sm:$0xff]  }
  0xdc   :  { %2107 = vmatpush1.bf16.msra.mxu1 %v4377_v52  ;;  %v4472_v52 = vld [vmem:[#allocation5 + $0x44] ss:$24 sps:$4 sm:$0xff]  }
  0xdd   :  { %2108 = vmatprep.subr.bf16.mxu1 %v4385_v53  ;;  %v4467_v53 = vld [vmem:[#allocation5 + $0x370] ss:$24 sps:$4 sm:$0xff]  }
  0xde   :  { %2068 = vmatpush1.bf16.msra.mxu0 %v4380_v55  ;;  %v4470_v55 = vld [vmem:[#allocation5 + $0x40] ss:$24 sps:$4 sm:$0xff]  }
  0xdf   :  { %2069 = vmatprep.subr.bf16.mxu0 %v4388_v56  ;;  %v4475_v56 = vld [vmem:[#allocation5 + $0x344] ss:$24 sps:$4 sm:$0xff]  }
  0xe0   :  { %2109 = vmatpush1.bf16.msra.mxu1 %v4383_v57  ;;  %v4478_v57 = vld [vmem:[#allocation5 + $0x14] ss:$24 sps:$4 sm:$0xff]  }
  0xe1   :  { %2110 = vmatprep.subr.bf16.mxu1 %v4391_v60  ;;  %v4473_v60 = vld [vmem:[#allocation5 + $0x340] ss:$24 sps:$4 sm:$0xff]  }
  0xe2   :  { %2070 = vmatpush2.bf16.msra.mxu0 %v4386_v61  ;;  %v4481_v61 = vld [vmem:[#allocation5 + $0x314] ss:$24 sps:$4 sm:$0xff]  }
  0xe3   :  { %2071 = vmatprep.subr.bf16.mxu0 %v4394_v63  ;;  %v4476_v63 = vld [vmem:[#allocation5 + $0x10] ss:$24 sps:$4 sm:$0xff]  }
  0xe4   :  { %2111 = vmatpush2.bf16.msra.mxu1 %v4389_v0  ;;  %v4484_v0 = vld [vmem:[#allocation5 + $0x2e4] ss:$24 sps:$4 sm:$0xff]  }
  0xe5   :  { %2112 = vmatprep.subr.bf16.mxu1 %v4397_v1  ;;  %v4479_v1 = vld [vmem:[#allocation5 + $0x310] ss:$24 sps:$4 sm:$0xff]  }
  0xe6   :  { %2072 = vmatpush2.bf16.msra.mxu0 %v4392_v2  ;;  %v4487_v2 = vld [vmem:[#allocation5 + $0x5e4] ss:$24 sps:$4 sm:$0xff]  }
  0xe7   :  { %2073 = vmatprep.subr.bf16.mxu0 %v4400_v3  ;;  %v4482_v3 = vld [vmem:[#allocation5 + $0x2e0] ss:$24 sps:$4 sm:$0xff]  }
  0xe8   :  { %2113 = vmatpush2.bf16.msra.mxu1 %v4395_v4  ;;  %v4490_v4 = vld [vmem:[#allocation5 + $0x2b4] ss:$24 sps:$4 sm:$0xff]  }
  0xe9   :  { %2114 = vmatprep.subr.bf16.mxu1 %v4403_v5  ;;  %v4485_v5 = vld [vmem:[#allocation5 + $0x5e0] ss:$24 sps:$4 sm:$0xff]  }
  0xea   :  { %2074 = vmatpush2.bf16.msra.mxu0 %v4398_v6  ;;  %v4488_v6 = vld [vmem:[#allocation5 + $0x2b0] ss:$24 sps:$4 sm:$0xff]  }
  0xeb   :  { %2075 = vmatprep.subr.bf16.mxu0 %v4406_v7  ;;  %v4493_v7 = vld [vmem:[#allocation5 + $0x5b4] ss:$24 sps:$4 sm:$0xff]  }
  0xec   :  { %2115 = vmatpush2.bf16.msra.mxu1 %v4401_v8  ;;  %v4491_v8 = vld [vmem:[#allocation5 + $0x5b0] ss:$24 sps:$4 sm:$0xff]  }
  0xed   :  { %2116 = vmatprep.subr.bf16.mxu1 %v4409_v9  ;;  %v4496_v9 = vld [vmem:[#allocation5 + $0x284] ss:$24 sps:$4 sm:$0xff]  }
  0xee   :  { %2076 = vmatpush2.bf16.msra.mxu0 %v4404_v10  ;;  %v4499_v10 = vld [vmem:[#allocation5 + $0x584] ss:$24 sps:$4 sm:$0xff]  }
  0xef   :  { %2077 = vmatprep.subr.bf16.mxu0 %v4412_v11  ;;  %v4494_v11 = vld [vmem:[#allocation5 + $0x280] ss:$24 sps:$4 sm:$0xff]  }
  0xf0   :  { %2117 = vmatpush2.bf16.msra.mxu1 %v4407_v12  ;;  %v4502_v12 = vld [vmem:[#allocation5 + $0x254] ss:$24 sps:$4 sm:$0xff]  }
  0xf1   :  { %2118 = vmatprep.subr.bf16.mxu1 %v4415_v13  ;;  %v4497_v13 = vld [vmem:[#allocation5 + $0x580] ss:$24 sps:$4 sm:$0xff]  }
  0xf2   :  { %2078 = vmatpush2.bf16.msra.mxu0 %v4410_v14  ;;  %v4505_v14 = vld [vmem:[#allocation5 + $0x554] ss:$24 sps:$4 sm:$0xff]  }
  0xf3   :  { %2079 = vmatprep.subr.bf16.mxu0 %v4418_v15  ;;  %v4500_v15 = vld [vmem:[#allocation5 + $0x250] ss:$24 sps:$4 sm:$0xff]  }
  0xf4   :  { %2119 = vmatpush2.bf16.msra.mxu1 %v4413_v16  ;;  %v4508_v16 = vld [vmem:[#allocation5 + $0x224] ss:$24 sps:$4 sm:$0xff]  }
  0xf5   :  { %2120 = vmatprep.subr.bf16.mxu1 %v4421_v17  ;;  %v4503_v17 = vld [vmem:[#allocation5 + $0x550] ss:$24 sps:$4 sm:$0xff]  }
  0xf6   :  { %2080 = vmatpush2.bf16.msra.mxu0 %v4416_v18  ;;  %v4511_v18 = vld [vmem:[#allocation5 + $0x524] ss:$24 sps:$4 sm:$0xff]  }
  0xf7   :  { %2081 = vmatprep.subr.bf16.mxu0 %v4424_v19  ;;  %v4506_v19 = vld [vmem:[#allocation5 + $0x220] ss:$24 sps:$4 sm:$0xff]  }
  0xf8   :  { %2121 = vmatpush2.bf16.msra.mxu1 %v4419_v20  ;;  %v4514_v20 = vld [vmem:[#allocation5 + $0x1f4] ss:$24 sps:$4 sm:$0xff]  }
  0xf9   :  { %2122 = vmatprep.subr.bf16.mxu1 %v4427_v21  ;;  %v4509_v21 = vld [vmem:[#allocation5 + $0x520] ss:$24 sps:$4 sm:$0xff]  }
  0xfa   :  { %2082 = vmatpush2.bf16.msra.mxu0 %v4422_v22  ;;  %v4517_v22 = vld [vmem:[#allocation5 + $0x4f4] ss:$24 sps:$4 sm:$0xff]  }
  0xfb   :  { %2083 = vmatprep.subr.bf16.mxu0 %v4430_v23  ;;  %v4512_v23 = vld [vmem:[#allocation5 + $0x1f0] ss:$24 sps:$4 sm:$0xff]  }
  0xfc   :  { %2123 = vmatpush2.bf16.msra.mxu1 %v4425_v24  ;;  %v4520_v24 = vld [vmem:[#allocation5 + $0x1c4] ss:$24 sps:$4 sm:$0xff]  }
  0xfd   :  { %2124 = vmatprep.subr.bf16.mxu1 %v4433_v25  ;;  %v4515_v25 = vld [vmem:[#allocation5 + $0x4f0] ss:$24 sps:$4 sm:$0xff]  }
  0xfe   :  { %2084 = vmatpush2.bf16.msra.mxu0 %v4428_v26  ;;  %v4523_v26 = vld [vmem:[#allocation5 + $0x4c4] ss:$24 sps:$4 sm:$0xff]  }
  0xff   :  { %2135 = vmatprep.subr.bf16.mxu0 %v4436_v27  ;;  %v4518_v27 = vld [vmem:[#allocation5 + $0x1c0] ss:$24 sps:$4 sm:$0xff]  }
 0x100   :  { %2125 = vmatpush2.bf16.msra.mxu1 %v4431_v28  ;;  %v4526_v28 = vld [vmem:[#allocation5 + $0x194] ss:$24 sps:$4 sm:$0xff]  }
 0x101   :  { %2086 = vmatmul.mubr.bf16.vlgmr.msra.gmra.mxu0 %v4986_v59  ;;  %2176 = vmatprep.subr.bf16.mxu1 %v4439_v29  ;;  %v4521_v29 = vld [vmem:[#allocation5 + $0x4c0] ss:$24 sps:$4 sm:$0xff]  }
 0x102   :  { %2136 = vmatpush1.bf16.msra.mxu0 %v4434_v30  ;;  %2167 = vmatprep.mubr.bf16.mxu0 %v4984_v58  ;;  %v4452_v58 = vld [vmem:[#allocation5 + $0xd0] ss:$24 sps:$4 sm:$0xff]   ;;  %v4529_v30 = vld [vmem:[#allocation5 + $0x494] ss:$24 sps:$4 sm:$0xff]  }
 0x103   :  { %2127 = vmatmul.mubr.bf16.vlgmr.msra.gmra.mxu1 %v4997_v39  ;;  %2137 = vmatprep.subr.bf16.mxu0 %v4442_v31  ;;  %v4460_v39 = vld [vmem:[#allocation5 + $0xa4] ss:$24 sps:$4 sm:$0xff]   ;;  %v4524_v31 = vld [vmem:[#allocation5 + $0x190] ss:$24 sps:$4 sm:$0xff]  }
 0x104   :  { %2177 = vmatpush1.bf16.msra.mxu1 %v4437_v32  ;;  %2208 = vmatprep.mubr.bf16.mxu1 %v4991_v62  ;;  %v4458_v62 = vld [vmem:[#allocation5 + $0xa0] ss:$24 sps:$4 sm:$0xff]   ;;  %v4532_v32 = vld [vmem:[#allocation5 + $0x764] ss:$24 sps:$4 sm:$0xff]  }
 0x105   :  { %2178 = vmatprep.subr.bf16.mxu1 %v4445_v33  ;;  %v4527_v33 = vld [vmem:[#allocation5 + $0x490] ss:$24 sps:$4 sm:$0xff]  }
 0x106   :  { %2138 = vmatpush1.bf16.msra.mxu0 %v4440_v34  ;;  %v4550_v34 = vld [vmem:[#allocation7 + $0x74] ss:$8 sps:$4 sm:$0xff]  }
 0x107   :  { %2139 = vmatprep.subr.bf16.mxu0 %v4448_v36  ;;  %v4530_v36 = vld [vmem:[#allocation5 + $0x760] ss:$24 sps:$4 sm:$0xff]  }
 0x108   :  { %2179 = vmatpush1.bf16.msra.mxu1 %v4443_v37  ;;  %v4535_v37 = vld [vmem:[#allocation5 + $0x734] ss:$24 sps:$4 sm:$0xff]  }
 0x109   :  { %2180 = vmatprep.subr.bf16.mxu1 %v4451_v38  ;;  %v4548_v38 = vld [vmem:[#allocation7 + $0x70] ss:$8 sps:$4 sm:$0xff]  }
 0x10a   :  { %2140 = vmatpush1.bf16.msra.mxu0 %v4446_v40  ;;  %v4533_v40 = vld [vmem:[#allocation5 + $0x730] ss:$24 sps:$4 sm:$0xff]  }
 0x10b   :  { %2141 = vmatprep.subr.bf16.mxu0 %v4454_v43  ;;  %v4556_v43 = vld [vmem:[#allocation7 + $0x64] ss:$8 sps:$4 sm:$0xff]  }
 0x10c   :  { %2181 = vmatpush1.bf16.msra.mxu1 %v4449_v44 }
 0x10d   :  { %2182 = vmatprep.subr.bf16.mxu1 %v4457_v45  ;;  %v4538_v45 = vld [vmem:[#allocation5 + $0x704] ss:$24 sps:$4 sm:$0xff]  }
 0x10e   :  { %2142 = vmatpush1.bf16.msra.mxu0 %v4452_v58 }
 0x10f   :  { %2143 = vmatprep.subr.bf16.mxu0 %v4460_v39 }
 0x110   :  { %2183 = vmatpush1.bf16.msra.mxu1 %v4455_v46  ;;  %v4554_v46 = vld [vmem:[#allocation7 + $0x60] ss:$8 sps:$4 sm:$0xff]  }
 0x111   :  { %2184 = vmatprep.subr.bf16.mxu1 %v4463_v47  ;;  %v4536_v47 = vld [vmem:[#allocation5 + $0x700] ss:$24 sps:$4 sm:$0xff]  }
 0x112   :  { %2144 = vmatpush1.bf16.msra.mxu0 %v4458_v62  ;;  %v4562_v62 = vld [vmem:[#allocation7 + $0x54] ss:$8 sps:$4 sm:$0xff]  }
 0x113   :  { %2145 = vmatprep.subr.bf16.mxu0 %v4466_v48 }
 0x114   :  { %2185 = vmatpush1.bf16.msra.mxu1 %v4461_v49 }
 0x115   :  { %2186 = vmatprep.subr.bf16.mxu1 %v4469_v50  ;;  %v4541_v50 = vld [vmem:[#allocation5 + $0x6d4] ss:$24 sps:$4 sm:$0xff]  }
 0x116   :  { %2146 = vmatpush1.bf16.msra.mxu0 %v4464_v51  ;;  %v4560_v51 = vld [vmem:[#allocation7 + $0x50] ss:$8 sps:$4 sm:$0xff]  }
 0x117   :  { %2147 = vmatprep.subr.bf16.mxu0 %v4472_v52  ;;  %v4539_v52 = vld [vmem:[#allocation5 + $0x6d0] ss:$24 sps:$4 sm:$0xff]  }
 0x118   :  { %2187 = vmatpush1.bf16.msra.mxu1 %v4467_v53  ;;  %v4544_v53 = vld [vmem:[#allocation5 + $0x6a4] ss:$24 sps:$4 sm:$0xff]  }
 0x119   :  { %2188 = vmatprep.subr.bf16.mxu1 %v4475_v56  ;;  %v4566_v56 = vld [vmem:[#allocation7 + $0x40] ss:$8 sps:$4 sm:$0xff]  }
 0x11a   :  { %2148 = vmatpush1.bf16.msra.mxu0 %v4470_v55 }
 0x11b   :  { %2149 = vmatprep.subr.bf16.mxu0 %v4478_v57  ;;  %v4574_v57 = vld [vmem:[#allocation7 + $0x34] ss:$8 sps:$4 sm:$0xff]  }
 0x11c   :  { %2189 = vmatpush1.bf16.msra.mxu1 %v4473_v60  ;;  %v4542_v60 = vld [vmem:[#allocation5 + $0x6a0] ss:$24 sps:$4 sm:$0xff]  }
 0x11d   :  { %2190 = vmatprep.subr.bf16.mxu1 %v4481_v61  ;;  %v4547_v61 = vld [vmem:[#allocation5 + $0x674] ss:$24 sps:$4 sm:$0xff]  }
 0x11e   :  { %2150 = vmatpush1.bf16.msra.mxu0 %v4476_v63  ;;  %v4572_v63 = vld [vmem:[#allocation7 + $0x30] ss:$8 sps:$4 sm:$0xff]  }
 0x11f   :  { %2151 = vmatprep.subr.bf16.mxu0 %v4484_v0  ;;  %v4580_v0 = vld [vmem:[#allocation7 + $0x24] ss:$8 sps:$4 sm:$0xff]  }
 0x120   :  { %2191 = vmatpush1.bf16.msra.mxu1 %v4479_v1  ;;  %v4545_v1 = vld [vmem:[#allocation5 + $0x670] ss:$24 sps:$4 sm:$0xff]  }
 0x121   :  { %2192 = vmatprep.subr.bf16.mxu1 %v4487_v2  ;;  %v4553_v2 = vld [vmem:[#allocation5 + $0x644] ss:$24 sps:$4 sm:$0xff]  }
 0x122   :  { %2152 = vmatpush2.bf16.msra.mxu0 %v4482_v3  ;;  %v4578_v3 = vld [vmem:[#allocation7 + $0x20] ss:$8 sps:$4 sm:$0xff]  }
 0x123   :  { %2153 = vmatprep.subr.bf16.mxu0 %v4490_v4  ;;  %v4586_v4 = vld [vmem:[#allocation7 + $0x14] ss:$8 sps:$4 sm:$0xff]  }
 0x124   :  { %2193 = vmatpush2.bf16.msra.mxu1 %v4485_v5  ;;  %v4551_v5 = vld [vmem:[#allocation5 + $0x640] ss:$24 sps:$4 sm:$0xff]  }
 0x125   :  { %2194 = vmatprep.subr.bf16.mxu1 %v4493_v7  ;;  %v4584_v7 = vld [vmem:[#allocation7 + $0x10] ss:$8 sps:$4 sm:$0xff]  }
 0x126   :  { %2154 = vmatpush2.bf16.msra.mxu0 %v4488_v6  ;;  %v4559_v6 = vld [vmem:[#allocation5 + $0x614] ss:$24 sps:$4 sm:$0xff]  }
 0x127   :  { %2155 = vmatprep.subr.bf16.mxu0 %v4496_v9  ;;  %v4557_v9 = vld [vmem:[#allocation5 + $0x610] ss:$24 sps:$4 sm:$0xff]  }
 0x128   :  { %2195 = vmatpush2.bf16.msra.mxu1 %v4491_v8  ;;  %v4592_v8 = vld [vmem:[#allocation7 + $0x4] ss:$8 sps:$4 sm:$0xff]  }
 0x129   :  { %2196 = vmatprep.subr.bf16.mxu1 %v4499_v10  ;;  %v4565_v10 = vld [vmem:[#allocation5 + $0x8e4] ss:$24 sps:$4 sm:$0xff]  }
 0x12a   :  { %2156 = vmatpush2.bf16.msra.mxu0 %v4494_v11  ;;  %v4590_v11 = vld [vmem:[#allocation7] ss:$8 sps:$4 sm:$0xff]  }
 0x12b   :  { %2157 = vmatprep.subr.bf16.mxu0 %v4502_v12  ;;  %v4598_v12 = vld [vmem:[#allocation7 + $0xf4] ss:$8 sps:$4 sm:$0xff]  }
 0x12c   :  { %2197 = vmatpush2.bf16.msra.mxu1 %v4497_v13  ;;  %v4563_v13 = vld [vmem:[#allocation5 + $0x8e0] ss:$24 sps:$4 sm:$0xff]  }
 0x12d   :  { %2198 = vmatprep.subr.bf16.mxu1 %v4505_v14  ;;  %v4571_v14 = vld [vmem:[#allocation5 + $0x8b4] ss:$24 sps:$4 sm:$0xff]  }
 0x12e   :  { %2158 = vmatpush2.bf16.msra.mxu0 %v4500_v15  ;;  %v4596_v15 = vld [vmem:[#allocation7 + $0xf0] ss:$8 sps:$4 sm:$0xff]  }
 0x12f   :  { %2159 = vmatprep.subr.bf16.mxu0 %v4508_v16  ;;  %v4604_v16 = vld [vmem:[#allocation7 + $0xe4] ss:$8 sps:$4 sm:$0xff]  }
 0x130   :  { %2199 = vmatpush2.bf16.msra.mxu1 %v4503_v17  ;;  %v4569_v17 = vld [vmem:[#allocation5 + $0x8b0] ss:$24 sps:$4 sm:$0xff]  }
 0x131   :  { %2200 = vmatprep.subr.bf16.mxu1 %v4511_v18  ;;  %v4577_v18 = vld [vmem:[#allocation5 + $0x884] ss:$24 sps:$4 sm:$0xff]  }
 0x132   :  { %2160 = vmatpush2.bf16.msra.mxu0 %v4506_v19  ;;  %v4602_v19 = vld [vmem:[#allocation7 + $0xe0] ss:$8 sps:$4 sm:$0xff]  }
 0x133   :  { %2161 = vmatprep.subr.bf16.mxu0 %v4514_v20  ;;  %v4610_v20 = vld [vmem:[#allocation7 + $0xd4] ss:$8 sps:$4 sm:$0xff]  }
 0x134   :  { %2201 = vmatpush2.bf16.msra.mxu1 %v4509_v21  ;;  %v4575_v21 = vld [vmem:[#allocation5 + $0x880] ss:$24 sps:$4 sm:$0xff]  }
 0x135   :  { %2202 = vmatprep.subr.bf16.mxu1 %v4517_v22  ;;  %v4583_v22 = vld [vmem:[#allocation5 + $0x854] ss:$24 sps:$4 sm:$0xff]  }
 0x136   :  { %2162 = vmatpush2.bf16.msra.mxu0 %v4512_v23  ;;  %v4608_v23 = vld [vmem:[#allocation7 + $0xd0] ss:$8 sps:$4 sm:$0xff]  }
 0x137   :  { %2163 = vmatprep.subr.bf16.mxu0 %v4520_v24  ;;  %v4613_v24 = vld [vmem:[#allocation7 + $0xc4] ss:$8 sps:$4 sm:$0xff]  }
 0x138   :  { %2203 = vmatpush2.bf16.msra.mxu1 %v4515_v25  ;;  %v4581_v25 = vld [vmem:[#allocation5 + $0x850] ss:$24 sps:$4 sm:$0xff]  }
 0x139   :  { %2204 = vmatprep.subr.bf16.mxu1 %v4523_v26  ;;  %v4589_v26 = vld [vmem:[#allocation5 + $0x824] ss:$24 sps:$4 sm:$0xff]  }
 0x13a   :  { %2164 = vmatpush2.bf16.msra.mxu0 %v4518_v27  ;;  %v4611_v27 = vld [vmem:[#allocation7 + $0xc0] ss:$8 sps:$4 sm:$0xff]  }
 0x13b   :  { %2165 = vmatprep.subr.bf16.mxu0 %v4526_v28  ;;  %v4616_v28 = vld [vmem:[#allocation7 + $0xb4] ss:$8 sps:$4 sm:$0xff]  }
 0x13c   :  { %2205 = vmatpush2.bf16.msra.mxu1 %v4521_v29  ;;  %v4587_v29 = vld [vmem:[#allocation5 + $0x820] ss:$24 sps:$4 sm:$0xff]  }
 0x13d   :  { %2206 = vmatprep.subr.bf16.mxu1 %v4529_v30  ;;  %v4595_v30 = vld [vmem:[#allocation5 + $0x7f4] ss:$24 sps:$4 sm:$0xff]  }
 0x13e   :  { %2166 = vmatpush2.bf16.msra.mxu0 %v4524_v31  ;;  %v86_v31 = vld [vmem:[#allocation10] ss:$8 sm:$0xf] }
 0x13f   :  { %2217 = vmatprep.subr.bf16.mxu0 %v4532_v32  ;;  %v4614_v32 = vld [vmem:[#allocation7 + $0xb0] ss:$8 sps:$4 sm:$0xff]  }
 0x140   :  { %2207 = vmatpush2.bf16.msra.mxu1 %v4527_v33  ;;  %v87_v33 = vld [vmem:[#allocation10] ss:$8 sm:$0x30] }
 0x141   :  { %v5012_v44 = vpop.f32.mrf.mxu0  ;;  %2168 = vmatmul.mubr.bf16.vlgmr.msra.gmra.mxu0 %v4980_v54  ;;  %2857 = vmatprep.subr.bf16.mxu1 %v4550_v34  ;;  %v4619_v34 = vld [vmem:[#allocation7 + $0xa4] ss:$8 sps:$4 sm:$0xff]  }
 0x142   :  { %2218 = vmatpush1.bf16.msra.mxu0 %v4530_v36  ;;  %2249 = vmatprep.mubr.bf16.mxu0 %v5001_v41  ;;  %v5018_v39 = vpop.f32.mrf.mxu1  ;;  %v4593_v36 = vld [vmem:[#allocation5 + $0x7f0] ss:$24 sps:$4 sm:$0xff]  }
 0x143   :  { %v5016_v58 = vpop.f32.mrf.mxu0  ;;  %2209 = vmatmul.mubr.bf16.vlgmr.msra.gmra.mxu1 %v4986_v59  ;;  %2219 = vmatprep.subr.bf16.mxu0 %v4535_v37  ;;  %v4568_v59 = vld [vmem:[#allocation7 + $0x44] ss:$8 sps:$4 sm:$0xff]  }
 0x144   :  { %2858 = vmatpush1.bf16.msra.mxu1 %v4548_v38  ;;  %v5021_v49 = vpop.f32.mrf.mxu1  ;;  %v4601_v37 = vld [vmem:[#allocation5 + $0x7c4] ss:$24 sps:$4 sm:$0xff]   ;;  %v5023_v38 = vor.u32 %v87_v33, %v86_v31  ;;  %v4650_v31 = vld [vmem:[#allocation7 + $0x1f0] ss:$8 sps:$4 sm:$0xff]   ;;  %v4683_v33 = vld [vmem:[#allocation7 + $0x240] ss:$8 sps:$4 sm:$0xff]  }
 0x145   :  { %v1927_v48 = vpop.f32.mrf.mxu0  ;;  %2859 = vmatprep.subr.bf16.mxu1 %v4556_v43  ;;  %v4617_v43 = vld [vmem:[#allocation7 + $0xa0] ss:$8 sps:$4 sm:$0xff]  }
 0x146   :  { %2220 = vmatpush1.bf16.msra.mxu0 %v4533_v40  ;;  %v1968_v41 = vpop.f32.mrf.mxu1  ;;  %v5026_v40 = vsub.s32 0, %v4977_v42 }
 0x147   :  { %v1928_v54 = vpop.f32.mrf.mxu0  ;;  %2221 = vmatprep.subr.bf16.mxu0 %v4538_v45  ;;  %v4622_v45 = vld [vmem:[#allocation7 + $0x94] ss:$8 sps:$4 sm:$0xff]  }
 0x148   :  { %2860 = vmatpush1.bf16.msra.mxu1 %v4554_v46  ;;  %v1969_v55 = vpop.f32.mrf.mxu1  ;;  %v5029_v46 = vsub.s32 1, %v4977_v42  ;;  %v389_v48 = vrot.slane %v5023_v38, %v5026_v40  ;;  %v4620_v54 = vld [vmem:[#allocation7 + $0x90] ss:$8 sps:$4 sm:$0xff]  }
 0x149   :  { %2861 = vmatprep.subr.bf16.mxu1 %v4562_v62  ;;  %v4607_v62 = vld [vmem:[#allocation5 + $0x794] ss:$24 sps:$4 sm:$0xff]  }
 0x14a   :  { %2222 = vmatpush1.bf16.msra.mxu0 %v4536_v47  ;;  %v4599_v47 = vld [vmem:[#allocation5 + $0x7c0] ss:$24 sps:$4 sm:$0xff]   ;;  %v393_v41 = vrot.slane %v5023_v38, %v5029_v46 }
 0x14b   :  { %2223 = vmatprep.subr.bf16.mxu0 %v4541_v50  ;;  %v4625_v50 = vld [vmem:[#allocation7 + $0x84] ss:$8 sps:$4 sm:$0xff]  }
 0x14c   :  { %2862 = vmatpush1.bf16.msra.mxu1 %v4560_v51  ;;  %v4605_v51 = vld [vmem:[#allocation5 + $0x790] ss:$24 sps:$4 sm:$0xff]   ;;  %v1926_v55 = vadd.f32 %v5016_v58, %v393_v41  ;;  %v4664_v41 = vld [vmem:[#allocation7 + $0x1b4] ss:$8 sps:$4 sm:$0xff]  }
 0x14d   :  { %2863 = vmatprep.subr.bf16.mxu1 %v4568_v59  ;;  %v4623_v59 = vld [vmem:[#allocation7 + $0x80] ss:$8 sps:$4 sm:$0xff]  }
 0x14e   :  { %2224 = vmatpush1.bf16.msra.mxu0 %v4539_v52  ;;  %v4628_v52 = vld [vmem:[#allocation7 + $0x174] ss:$8 sps:$4 sm:$0xff]  }
 0x14f   :  { %2225 = vmatprep.subr.bf16.mxu0 %v4544_v53  ;;  %v1924_v53 = vadd.f32 %v5012_v44, %v389_v48  ;;  %v4629_v44 = vld [vmem:[#allocation7 + $0x160] ss:$8 sps:$4 sm:$0xff]  }
 0x150   :  { %2864 = vmatpush1.bf16.msra.mxu1 %v4566_v56  ;;  %v4626_v56 = vld [vmem:[#allocation7 + $0x170] ss:$8 sps:$4 sm:$0xff]   ;;  %v4689_v48 = vld [vmem:[#allocation7 + $0x220] ss:$8 sps:$4 sm:$0xff]  }
 0x151   :  { %2865 = vmatprep.subr.bf16.mxu1 %v4574_v57  ;;  %v4631_v57 = vld [vmem:[#allocation7 + $0x164] ss:$8 sps:$4 sm:$0xff]  }
 0x152   :  { %2226 = vmatpush1.bf16.msra.mxu0 %v4542_v60  ;;  %v1965_v60 = vadd.f32 %v5018_v39, %v1924_v53  ;;  %v4632_v39 = vld [vmem:[#allocation7 + $0x150] ss:$8 sps:$4 sm:$0xff]  }
 0x153   :  { %2227 = vmatprep.subr.bf16.mxu0 %v4547_v61  ;;  %v4662_v53 = vld [vmem:[#allocation7 + $0x1b0] ss:$8 sps:$4 sm:$0xff]  }
 0x154   :  { %2866 = vmatpush1.bf16.msra.mxu1 %v4572_v63  ;;  %v4788_v63 = vld.sshfl [vmem:[#allocation2 + $0x8] sm:$0x33 pattern:$0x76325410] }
 0x155   :  { %2867 = vmatprep.subr.bf16.mxu1 %v4580_v0  ;;  %v1967_v0 = vadd.f32 %v5021_v49, %v1926_v55  ;;  %v4695_v55 = vld [vmem:[#allocation7 + $0x200] ss:$8 sps:$4 sm:$0xff]  }
 0x156   :  { %2228 = vmatpush1.bf16.msra.mxu0 %v4545_v1 }
 0x157   :  { %2229 = vmatprep.subr.bf16.mxu0 %v4553_v2 }
 0x158   :  { %2868 = vmatpush1.bf16.msra.mxu1 %v4578_v3  ;;  %v4634_v3 = vld [vmem:[#allocation7 + $0x154] ss:$8 sps:$4 sm:$0xff]  }
 0x159   :  { %2869 = vmatprep.subr.bf16.mxu1 %v4586_v4 }
 0x15a   :  { %2230 = vmatpush1.bf16.msra.mxu0 %v4551_v5 }
 0x15b   :  { %2231 = vmatprep.subr.bf16.mxu0 %v4559_v6 }
 0x15c   :  { %2870 = vmatpush1.bf16.msra.mxu1 %v4584_v7 }
 0x15d   :  { %2871 = vmatprep.subr.bf16.mxu1 %v4592_v8  ;;  %v4637_v8 = vld [vmem:[#allocation7 + $0x144] ss:$8 sps:$4 sm:$0xff]  }
 0x15e   :  { %2232 = vmatpush1.bf16.msra.mxu0 %v4557_v9  ;;  %v4676_v9 = vld [vmem:[#allocation7 + $0x274] ss:$8 sps:$4 sm:$0xff]  }
 0x15f   :  { %2233 = vmatprep.subr.bf16.mxu0 %v4565_v10 }
 0x160   :  { %2872 = vmatpush1.bf16.msra.mxu1 %v4590_v11  ;;  %v4635_v11 = vld [vmem:[#allocation7 + $0x140] ss:$8 sps:$4 sm:$0xff]  }
 0x161   :  { %2873 = vmatprep.subr.bf16.mxu1 %v4598_v12  ;;  %v4640_v12 = vld [vmem:[#allocation7 + $0x134] ss:$8 sps:$4 sm:$0xff]  }
 0x162   :  { %2234 = vmatpush2.bf16.msra.mxu0 %v4563_v13  ;;  %v4638_v13 = vld [vmem:[#allocation7 + $0x130] ss:$8 sps:$4 sm:$0xff]  }
 0x163   :  { %2235 = vmatprep.subr.bf16.mxu0 %v4571_v14  ;;  %v4643_v14 = vld [vmem:[#allocation7 + $0x124] ss:$8 sps:$4 sm:$0xff]  }
 0x164   :  { %2874 = vmatpush2.bf16.msra.mxu1 %v4596_v15 }
 0x165   :  { %2875 = vmatprep.subr.bf16.mxu1 %v4604_v16  ;;  %v4641_v16 = vld [vmem:[#allocation7 + $0x120] ss:$8 sps:$4 sm:$0xff]  }
 0x166   :  { %2236 = vmatpush2.bf16.msra.mxu0 %v4569_v17 }
 0x167   :  { %2237 = vmatprep.subr.bf16.mxu0 %v4577_v18  ;;  %v4646_v18 = vld [vmem:[#allocation7 + $0x114] ss:$8 sps:$4 sm:$0xff]  }
 0x168   :  { %2876 = vmatpush2.bf16.msra.mxu1 %v4602_v19 }
 0x169   :  { %2877 = vmatprep.subr.bf16.mxu1 %v4610_v20  ;;  %v4674_v20 = vld [vmem:[#allocation7 + $0x270] ss:$8 sps:$4 sm:$0xff]  }
 0x16a   :  { %2238 = vmatpush2.bf16.msra.mxu0 %v4575_v21 }
 0x16b   :  { %2239 = vmatprep.subr.bf16.mxu0 %v4583_v22  ;;  %v4679_v22 = vld [vmem:[#allocation7 + $0x264] ss:$8 sps:$4 sm:$0xff]  }
 0x16c   :  { %2878 = vmatpush2.bf16.msra.mxu1 %v4608_v23  ;;  %v4644_v23 = vld [vmem:[#allocation7 + $0x110] ss:$8 sps:$4 sm:$0xff]  }
 0x16d   :  { %2879 = vmatprep.subr.bf16.mxu1 %v4613_v24  ;;  %v4649_v24 = vld [vmem:[#allocation7 + $0x104] ss:$8 sps:$4 sm:$0xff]  }
 0x16e   :  { %2240 = vmatpush2.bf16.msra.mxu0 %v4581_v25  ;;  %v4677_v25 = vld [vmem:[#allocation7 + $0x260] ss:$8 sps:$4 sm:$0xff]  }
 0x16f   :  { %2241 = vmatprep.subr.bf16.mxu0 %v4589_v26  ;;  %v4682_v26 = vld [vmem:[#allocation7 + $0x254] ss:$8 sps:$4 sm:$0xff]  }
 0x170   :  { %2880 = vmatpush2.bf16.msra.mxu1 %v4611_v27  ;;  %v4647_v27 = vld [vmem:[#allocation7 + $0x100] ss:$8 sps:$4 sm:$0xff]  }
 0x171   :  { %2881 = vmatprep.subr.bf16.mxu1 %v4616_v28  ;;  %v4652_v28 = vld [vmem:[#allocation7 + $0x1f4] ss:$8 sps:$4 sm:$0xff]  }
 0x172   :  { %2242 = vmatpush2.bf16.msra.mxu0 %v4587_v29  ;;  %v4680_v29 = vld [vmem:[#allocation7 + $0x250] ss:$8 sps:$4 sm:$0xff]  }
 0x173   :  { %2243 = vmatprep.subr.bf16.mxu0 %v4595_v30  ;;  %v4685_v30 = vld [vmem:[#allocation7 + $0x244] ss:$8 sps:$4 sm:$0xff]  }
 0x174   :  { %2882 = vmatpush2.bf16.msra.mxu1 %v4614_v32  ;;  %v4655_v32 = vld [vmem:[#allocation7 + $0x1e4] ss:$8 sps:$4 sm:$0xff]  }
 0x175   :  { %2883 = vmatprep.subr.bf16.mxu1 %v4619_v34  ;;  %v4688_v34 = vld [vmem:[#allocation7 + $0x234] ss:$8 sps:$4 sm:$0xff]  }
 0x176   :  { %2244 = vmatpush2.bf16.msra.mxu0 %v4593_v36  ;;  %v4653_v36 = vld [vmem:[#allocation7 + $0x1e0] ss:$8 sps:$4 sm:$0xff]  }
 0x177   :  { %2245 = vmatprep.subr.bf16.mxu0 %v4601_v37  ;;  %v4658_v37 = vld [vmem:[#allocation7 + $0x1d4] ss:$8 sps:$4 sm:$0xff]  }
 0x178   :  { %2884 = vmatpush2.bf16.msra.mxu1 %v4617_v43  ;;  %v4686_v43 = vld [vmem:[#allocation7 + $0x230] ss:$8 sps:$4 sm:$0xff]  }
 0x179   :  { %2885 = vmatprep.subr.bf16.mxu1 %v4622_v45  ;;  %v4691_v45 = vld [vmem:[#allocation7 + $0x224] ss:$8 sps:$4 sm:$0xff]  }
 0x17a   :  { %2246 = vmatpush2.bf16.msra.mxu0 %v4599_v47  ;;  %v4656_v47 = vld [vmem:[#allocation7 + $0x1d0] ss:$8 sps:$4 sm:$0xff]  }
 0x17b   :  { %2247 = vmatprep.subr.bf16.mxu0 %v4607_v62  ;;  %v4661_v62 = vld [vmem:[#allocation7 + $0x1c4] ss:$8 sps:$4 sm:$0xff]  }
 0x17c   :  { %2886 = vmatpush2.bf16.msra.mxu1 %v4620_v54  ;;  %v4694_v54 = vld [vmem:[#allocation7 + $0x214] ss:$8 sps:$4 sm:$0xff]  }
 0x17d   :  { %2887 = vmatprep.subr.bf16.mxu1 %v4625_v50  ;;  %v4659_v50 = vld [vmem:[#allocation7 + $0x1c0] ss:$8 sps:$4 sm:$0xff]  }
 0x17e   :  { %2248 = vmatpush2.bf16.msra.mxu0 %v4605_v51  ;;  %v4692_v51 = vld [vmem:[#allocation7 + $0x210] ss:$8 sps:$4 sm:$0xff]  }
 0x17f   :  { %2898 = vmatprep.subr.bf16.mxu0 %v4628_v52  ;;  %v4697_v52 = vld [vmem:[#allocation7 + $0x204] ss:$8 sps:$4 sm:$0xff]  }
 0x180   :  { %2888 = vmatpush2.bf16.msra.mxu1 %v4623_v59  ;;  %v4667_v59 = vld [vmem:[#allocation7 + $0x1a4] ss:$8 sps:$4 sm:$0xff]  }
 0x181   :  { %v2005_v61 = vpop.f32.mrf.mxu0  ;;  %2250 = vmatmul.mubr.bf16.vlgmr.msra.gmra.mxu0 %v4788_v63  ;;  %2939 = vmatprep.subr.bf16.mxu1 %v4676_v9  ;;  %v4703_v63 = vld [vmem:[#allocation7 + $0x2e4] ss:$8 sps:$4 sm:$0xff]  }
 0x182   :  { %v2006_v1 = vadd.f32 %v2005_v61, %v1965_v60  ;;  %2899 = vmatpush1.bf16.msra.mxu0 %v4626_v56  ;;  %v4700_v56 = vld [vmem:[#allocation7 + $0x2f4] ss:$8 sps:$4 sm:$0xff]   ;;  %v4698_v61 = vld [vmem:[#allocation7 + $0x2f0] ss:$8 sps:$4 sm:$0xff]  }
 0x183   :  { %v2007_v2 = vpop.f32.mrf.mxu0  ;;  %2900 = vmatprep.subr.bf16.mxu0 %v4631_v57  ;;  %v5039_v4 = vpop.f32.mrf.mxu1  ;;  %v4665_v57 = vld [vmem:[#allocation7 + $0x1a0] ss:$8 sps:$4 sm:$0xff]   ;;  %v4670_v60 = vld [vmem:[#allocation7 + $0x194] ss:$8 sps:$4 sm:$0xff]  }
 0x184   :  { %v2008_v58 = vadd.f32 %v2007_v2, %v1967_v0  ;;  %4770 = vtanh.f32 %v2006_v1  ;;  %v396_v0 = vsub.s32 2, %v4977_v42  ;;  %v4668_v1 = vld [vmem:[#allocation7 + $0x190] ss:$8 sps:$4 sm:$0xff]   ;;  %v400_v2 = vsub.s32 3, %v4977_v42 }
 0x185   :  { %v2009_v5 = vpop.f32.mrf.mxu0  ;;  %v5041_v6 = vpop.f32.mrf.mxu1 }
 0x186   :  { %4772 = vtanh.f32 %v2008_v58  ;;  %2901 = vmatpush1.bf16.msra.mxu0 %v4629_v44  ;;  %v4673_v44 = vld [vmem:[#allocation7 + $0x184] ss:$8 sps:$4 sm:$0xff]   ;;  %v4706_v58 = vld [vmem:[#allocation7 + $0x2d4] ss:$8 sps:$4 sm:$0xff]   ;;  %v397_v5 = vrot.slane %v5023_v38, %v396_v0 }
 0x187   :  { %v2010_v7 = vpop.f32.mrf.mxu0  ;;  %2902 = vmatprep.subr.bf16.mxu0 %v4634_v3  ;;  %v2050_v49 = vpop.f32.mrf.mxu1  ;;  %v4701_v3 = vld [vmem:[#allocation7 + $0x2e0] ss:$8 sps:$4 sm:$0xff]  }
 0x188   :  { %v401_v7 = vrot.slane %v5023_v38, %v400_v2  ;;  %v2047_v49 = vadd.f32 %v5039_v4, %v397_v5 }
 0x189   :  { %v2051_v10 = vpop.f32.mrf.mxu1 }
 0x18a   :  { %2903 = vmatpush1.bf16.msra.mxu0 %v4632_v39  ;;  %v4671_v39 = vld [vmem:[#allocation7 + $0x180] ss:$8 sps:$4 sm:$0xff]   ;;  %v2049_v9 = vadd.f32 %v5041_v6, %v401_v7  ;;  %v4715_v6 = vld [vmem:[#allocation7 + $0x2a4] ss:$8 sps:$4 sm:$0xff]  }
 0x18b   :  { %2904 = vmatprep.subr.bf16.mxu0 %v4637_v8  ;;  %v4704_v8 = vld [vmem:[#allocation7 + $0x2d0] ss:$8 sps:$4 sm:$0xff]  }
 0x18e   :  { %2905 = vmatpush1.bf16.msra.mxu0 %v4635_v11  ;;  %v4709_v11 = vld [vmem:[#allocation7 + $0x2c4] ss:$8 sps:$4 sm:$0xff]  }
 0x18f   :  { %2906 = vmatprep.subr.bf16.mxu0 %v4640_v12 }
 0x191   :  { %v5043_v15 = vpop.eup %4770 }
 0x192   :  { %2907 = vmatpush1.bf16.msra.mxu0 %v4638_v13  ;;  %v2264_v21 = vpack.c.bf16 %v5043_v15, %v5043_v15  ;;  %v4707_v13 = vld [vmem:[#allocation7 + $0x2c0] ss:$8 sps:$4 sm:$0xff]  }
 0x193   :  { %v5045_v17 = vpop.eup %4772  ;;  %2908 = vmatprep.subr.bf16.mxu0 %v4643_v14 }
 0x194   :  { %v2265_v19 = vpack.c.bf16 %v5045_v17, %v5045_v17 }
 0x196   :  { %2889 = vmatprep.mubr.bf16.mxu1 %v2265_v19  ;;  %2909 = vmatpush1.bf16.msra.mxu0 %v4641_v16 }
 0x197   :  { %2890 = vmatmul.mubr.bf16.vlgmr.msra.gmra.mxu1 %v2264_v21  ;;  %2910 = vmatprep.subr.bf16.mxu0 %v4646_v18 }
 0x198   :  { %2940 = vmatpush1.bf16.msra.mxu1 %v4674_v20 }
 0x199   :  { %2941 = vmatprep.subr.bf16.mxu1 %v4679_v22  ;;  %v4712_v22 = vld [vmem:[#allocation7 + $0x2b4] ss:$8 sps:$4 sm:$0xff]  }
 0x19a   :  { %2911 = vmatpush1.bf16.msra.mxu0 %v4644_v23 }
 0x19b   :  { %2912 = vmatprep.subr.bf16.mxu0 %v4649_v24  ;;  %v4710_v24 = vld [vmem:[#allocation7 + $0x2b0] ss:$8 sps:$4 sm:$0xff]  }
 0x19c   :  { %2942 = vmatpush1.bf16.msra.mxu1 %v4677_v25 }
 0x19d   :  { %2943 = vmatprep.subr.bf16.mxu1 %v4682_v26  ;;  %v4713_v26 = vld [vmem:[#allocation7 + $0x2a0] ss:$8 sps:$4 sm:$0xff]  }
 0x19e   :  { %2913 = vmatpush1.bf16.msra.mxu0 %v4647_v27 }
 0x19f   :  { %2914 = vmatprep.subr.bf16.mxu0 %v4652_v28  ;;  %v4718_v28 = vld [vmem:[#allocation7 + $0x294] ss:$8 sps:$4 sm:$0xff]  }
 0x1a0   :  { %2944 = vmatpush1.bf16.msra.mxu1 %v4680_v29  ;;  %v4716_v29 = vld [vmem:[#allocation7 + $0x290] ss:$8 sps:$4 sm:$0xff]  }
 0x1a1   :  { %2945 = vmatprep.subr.bf16.mxu1 %v4685_v30  ;;  %v4721_v30 = vld [vmem:[#allocation7 + $0x284] ss:$8 sps:$4 sm:$0xff]  }
 0x1a2   :  { %2915 = vmatpush2.bf16.msra.mxu0 %v4650_v31  ;;  %v4719_v31 = vld [vmem:[#allocation7 + $0x280] ss:$8 sps:$4 sm:$0xff]  }
 0x1a3   :  { %2916 = vmatprep.subr.bf16.mxu0 %v4655_v32 }
 0x1a4   :  { %2946 = vmatpush1.bf16.msra.mxu1 %v4683_v33 }
 0x1a5   :  { %2947 = vmatprep.subr.bf16.mxu1 %v4688_v34 }
 0x1a6   :  { %2917 = vmatpush2.bf16.msra.mxu0 %v4653_v36 }
 0x1a7   :  { %2918 = vmatprep.subr.bf16.mxu0 %v4658_v37 }
 0x1a8   :  { %2948 = vmatpush1.bf16.msra.mxu1 %v4686_v43 }
 0x1a9   :  { %2949 = vmatprep.subr.bf16.mxu1 %v4691_v45 }
 0x1aa   :  { %2919 = vmatpush2.bf16.msra.mxu0 %v4656_v47 }
 0x1ab   :  { %2920 = vmatprep.subr.bf16.mxu0 %v4661_v62 }
 0x1ac   :  { %2950 = vmatpush1.bf16.msra.mxu1 %v4689_v48 }
 0x1ad   :  { %2951 = vmatprep.subr.bf16.mxu1 %v4694_v54 }
 0x1ae   :  { %2921 = vmatpush2.bf16.msra.mxu0 %v4659_v50 }
 0x1af   :  { %2922 = vmatprep.subr.bf16.mxu0 %v4664_v41  ;;  %v404_v41 = vsub.s32 4, %v4977_v42 }
 0x1b0   :  { %2952 = vmatpush1.bf16.msra.mxu1 %v4692_v51  ;;  %v408_v51 = vsub.s32 5, %v4977_v42 }
 0x1b1   :  { %2953 = vmatprep.subr.bf16.mxu1 %v4697_v52  ;;  %v405_v52 = vrot.slane %v5023_v38, %v404_v41  ;;  %v4732_v41 = vld [vmem:[#allocation8 + $0xe8] sm:$0xff]  }
 0x1b2   :  { %2923 = vmatpush2.bf16.msra.mxu0 %v4662_v53  ;;  %v409_v53 = vrot.slane %v5023_v38, %v408_v51  ;;  %v4731_v51 = vld [vmem:[#allocation8 + $0x28] sm:$0xff]  }
 0x1b3   :  { %2924 = vmatprep.subr.bf16.mxu0 %v4667_v59 }
 0x1b4   :  { %2954 = vmatpush1.bf16.msra.mxu1 %v4695_v55 }
 0x1b5   :  { %2955 = vmatprep.subr.bf16.mxu1 %v4700_v56 }
 0x1b6   :  { %2925 = vmatpush2.bf16.msra.mxu0 %v4665_v57 }
 0x1b7   :  { %2926 = vmatprep.subr.bf16.mxu0 %v4670_v60 }
 0x1b8   :  { %2956 = vmatpush2.bf16.msra.mxu1 %v4698_v61 }
 0x1b9   :  { %2957 = vmatprep.subr.bf16.mxu1 %v4703_v63 }
 0x1ba   :  { %2927 = vmatpush2.bf16.msra.mxu0 %v4668_v1 }
 0x1bb   :  { %2928 = vmatprep.subr.bf16.mxu0 %v4673_v44 }
 0x1bc   :  { %2958 = vmatpush2.bf16.msra.mxu1 %v4701_v3 }
 0x1bd   :  { %2959 = vmatprep.subr.bf16.mxu1 %v4706_v58 }
 0x1be   :  { %2929 = vmatpush2.bf16.msra.mxu0 %v4671_v39 }
 0x1c0   :  { %2960 = vmatpush2.bf16.msra.mxu1 %v4704_v8  ;;  %v90_v8 = vld [vmem:[#allocation10 + $0x1] ss:$8 sm:$0x3] }
 0x1c1   :  { %v2087_v10 = vpop.f32.mrf.mxu0  ;;  %2961 = vmatprep.subr.bf16.mxu1 %v4709_v11 }
 0x1c2   :  { %v2088_v12 = vadd.f32 %v2087_v10, %v2047_v49  ;;  %v2370_v49 = vrot.slane %v90_v8, %v5026_v40 }
 0x1c3   :  { %v2089_v14 = vpop.f32.mrf.mxu0  ;;  %v2128_v16 = vpop.f32.mrf.mxu1 }
 0x1c4   :  { %v2090_v18 = vadd.f32 %v2089_v14, %v2049_v9  ;;  %v2129_v19 = vadd.f32 %v2128_v16, %v2088_v12  ;;  %2962 = vmatpush2.bf16.msra.mxu1 %v4707_v13  ;;  %v2374_v9 = vrot.slane %v90_v8, %v5029_v46 }
 0x1c5   :  { %v2091_v20 = vpop.f32.mrf.mxu0  ;;  %v2130_v21 = vpop.f32.mrf.mxu1  ;;  %2963 = vmatprep.subr.bf16.mxu1 %v4712_v22 }
 0x1c6   :  { %v2131_v23 = vadd.f32 %v2130_v21, %v2090_v18  ;;  %4774 = vtanh.f32 %v2129_v19  ;;  %v92_v20 = vld [vmem:[#allocation10 + $0x2] ss:$8 sm:$0x3] }
 0x1c7   :  { %v2092_v4 = vpop.f32.mrf.mxu0  ;;  %v2132_v25 = vpop.f32.mrf.mxu1 }
 0x1c8   :  { %4776 = vtanh.f32 %v2131_v23  ;;  %2964 = vmatpush2.bf16.msra.mxu1 %v4710_v24  ;;  %v2986_v23 = vrot.slane %v92_v20, %v5026_v40  ;;  %v4723_v40 = vld [vmem:[#allocation8 + $0x38] sm:$0xff]  }
 0x1c9   :  { %v2133_v27 = vpop.f32.mrf.mxu1  ;;  %2965 = vmatprep.subr.bf16.mxu1 %v4715_v6  ;;  %v2990_v6 = vrot.slane %v92_v20, %v5029_v46  ;;  %v4728_v46 = vld [vmem:[#allocation8 + $0xf0] sm:$0xff]   ;;  %v4746_v20 = vld [vmem:[#allocation8 + $0x48] sm:$0xff]  }
 0x1cc   :  { %2966 = vmatpush2.bf16.msra.mxu1 %v4713_v26 }
 0x1cd   :  { %2967 = vmatprep.subr.bf16.mxu1 %v4718_v28 }
 0x1d0   :  { %2968 = vmatpush2.bf16.msra.mxu1 %v4716_v29 }
 0x1d1   :  { %2969 = vmatprep.subr.bf16.mxu1 %v4721_v30 }
 0x1d3   :  { %v5057_v32 = vpop.eup %4774 }
 0x1d4   :  { %2970 = vmatpush2.bf16.msra.mxu1 %v4719_v31  ;;  %v2266_v36 = vpack.c.bf16 %v5057_v32, %v5057_v32 }
 0x1d5   :  { %v5059_v33 = vpop.eup %4776 }
 0x1d6   :  { %v2267_v34 = vpack.c.bf16 %v5059_v33, %v5059_v33 }
 0x1d8   :  { %2930 = vmatprep.mubr.bf16.mxu0 %v2267_v34 }
 0x1d9   :  { %2931 = vmatmul.mubr.bf16.vlgmr.msra.gmra.mxu0 %v2266_v36 }
 0x201   :  { %v2169_v37 = vpop.f32.mrf.mxu0 }
 0x202   :  { %v2170_v59 = vadd.f32 %v2169_v37, %v405_v52  ;;  %v4929_v37 = vmov 0   ;;  %v4733_v52 = vld [vmem:[#allocation8 + $0xa8] sm:$0xff]  }
 0x203   :  { %v2171_v43 = vpop.f32.mrf.mxu0  ;;  %v2210_v45 = vpop.f32.mrf.mxu1  ;;  %4144 = vset.pattern.permute.xlu1 %v4929_v37  ;;  %4143 = vset.pattern.permute.xlu0 %v4929_v37 }
 0x204   :  { %v2172_v55 = vadd.f32 %v2171_v43, %v409_v53  ;;  %v2211_v56 = vadd.f32 %v2210_v45, %v2170_v59  ;;  %v4722_v43 = vld [vmem:[#allocation8 + $0x78] sm:$0xff]   ;;  %v4734_v53 = vld [vmem:[#allocation8 + $0x60] sm:$0xff]  }
 0x205   :  { %v2173_v47 = vpop.f32.mrf.mxu0  ;;  %v2212_v62 = vpop.f32.mrf.mxu1  ;;  %v4724_v45 = vld [vmem:[#allocation8 + $0xf8] sm:$0xff]   ;;  %4063 = vmatprep.subr.bf16.mxu0 %v4722_v43  ;;  %v4736_v59 = vld [vmem:[#allocation8 + $0xe0] sm:$0xff]  }
 0x206   :  { %v2213_v60 = vadd.f32 %v2212_v62, %v2172_v55  ;;  %v4725_v47 = vld [vmem:[#allocation8 + $0xb8] sm:$0xff]   ;;  %v4726_v62 = vld [vmem:[#allocation8 + $0x70] sm:$0xff]   ;;  %4085 = vmatprep.subr.bf16.mxu1 %v4724_v45  ;;  %4064 = vmatpush3.bf16.msra.mxu0 %v4723_v40  ;;  %v4735_v55 = vld [vmem:[#allocation8 + $0x20] sm:$0xff]  }
 0x207   :  { %v2174_v48 = vpop.f32.mrf.mxu0  ;;  %v2214_v54 = vpop.f32.mrf.mxu1  ;;  %4065 = vmatprep.subr.bf16.mxu0 %v4726_v62 }
 0x208   :  { %v4727_v48 = vld [vmem:[#allocation8 + $0x30] sm:$0xff]  }
 0x209   :  { %v2215_v50 = vpop.f32.mrf.mxu1  ;;  %v4729_v54 = vld [vmem:[#allocation8 + $0xb0] sm:$0xff]  }
 0x20a   :  { %v4730_v50 = vld [vmem:[#allocation8 + $0x68] sm:$0xff]   ;;  %4066 = vmatpush3.bf16.msra.mxu0 %v4727_v48 }
 0x20b   :  { %4067 = vmatprep.subr.bf16.mxu0 %v4730_v50 }
 0x20e   :  { %4068 = vmatpush3.bf16.msra.mxu0 %v4731_v51 }
 0x20f   :  { %4069 = vmatprep.subr.bf16.mxu0 %v4734_v53 }
 0x212   :  { %4070 = vmatpush3.bf16.msra.mxu0 %v4735_v55 }
 0x241   :  { %v2251_v57 = vpop.f32.mrf.mxu0 }
 0x242   :  { %v2252_v61 = vadd.f32 %v2251_v57, %v2211_v56  ;;  %v4737_v56 = vld [vmem:[#allocation8 + $0xa0] sm:$0xff]   ;;  %v4738_v57 = vld [vmem:[#allocation8 + $0x58] sm:$0xff]  }
 0x243   :  { %v2253_v63 = vpop.f32.mrf.mxu0  ;;  %4071 = vmatprep.subr.bf16.mxu0 %v4738_v57 }
 0x244   :  { %v2254_v0 = vadd.f32 %v2253_v63, %v2213_v60  ;;  %4778 = vtanh.f32 %v2252_v61  ;;  %v4740_v60 = vld [vmem:[#allocation8 + $0xd8] sm:$0xff]  }
 0x245   :  { %v2255_v1 = vpop.f32.mrf.mxu0  ;;  %v4739_v61 = vld [vmem:[#allocation8 + $0x18] sm:$0xff]  }
 0x246   :  { %4780 = vtanh.f32 %v2254_v0  ;;  %v4741_v63 = vld [vmem:[#allocation8 + $0x98] sm:$0xff]   ;;  %4072 = vmatpush3.bf16.msra.mxu0 %v4739_v61  ;;  %v94_v0 = vld [vmem:[#allocation10 + $0x4] ss:$0 sm:$0xff] }
 0x247   :  { %v2256_v44 = vpop.f32.mrf.mxu0 }
 0x251   :  { %v5069_v2 = vpop.eup %4778 }
 0x252   :  { %v2268_v38 = vpack.c.bf16 %v5069_v2, %v5069_v2 }
 0x253   :  { %v5071_v3 = vpop.eup %4780 }
 0x254   :  { %v2269_v42 = vpack.c.bf16 %v5071_v3, %v5071_v3 }
 0x256   :  { %2971 = vmatprep.mubr.bf16.mxu1 %v2269_v42 }
 0x257   :  { %v2891_v58 = vpop.f32.mrf.mxu1  ;;  %2972 = vmatmul.mubr.bf16.vlgmr.msra.gmra.mxu1 %v2268_v38 }
 0x258   :  { %v2892_v10 = vadd.f32 %v2891_v58, %v2370_v49  ;;  %4086 = vmatpush3.bf16.msra.mxu1 %v4725_v47 }
 0x259   :  { %v2893_v5 = vpop.f32.mrf.mxu1  ;;  %4087 = vmatprep.subr.bf16.mxu1 %v4728_v46 }
 0x25a   :  { %v2894_v12 = vadd.f32 %v2893_v5, %v2374_v9 }
 0x25b   :  { %v2895_v39 = vpop.f32.mrf.mxu1 }
 0x25c   :  { %4088 = vmatpush3.bf16.msra.mxu1 %v4729_v54 }
 0x25d   :  { %v2896_v7 = vpop.f32.mrf.mxu1  ;;  %4089 = vmatprep.subr.bf16.mxu1 %v4732_v41 }
 0x260   :  { %4090 = vmatpush3.bf16.msra.mxu1 %v4733_v52 }
 0x261   :  { %4091 = vmatprep.subr.bf16.mxu1 %v4736_v59 }
 0x264   :  { %4092 = vmatpush3.bf16.msra.mxu1 %v4737_v56 }
 0x265   :  { %4093 = vmatprep.subr.bf16.mxu1 %v4740_v60 }
 0x268   :  { %4094 = vmatpush3.bf16.msra.mxu1 %v4741_v63 }
 0x299   :  { %v2932_v11 = vpop.f32.mrf.mxu0 }
 0x29a   :  { %v2933_v13 = vadd.f32 %v2932_v11, %v2892_v10 }
 0x29b   :  { %v2934_v14 = vpop.f32.mrf.mxu0 }
 0x29c   :  { %v2935_v16 = vadd.f32 %v2934_v14, %v2894_v12  ;;  %v4743_v14 = vld [vmem:[#allocation8 + $0x10] sm:$0xff]  }
 0x29d   :  { %v2936_v18 = vpop.f32.mrf.mxu0 }
 0x29e   :  { %v4745_v18 = vld [vmem:[#allocation8 + $0x90] sm:$0xff]  }
 0x29f   :  { %v2937_v19 = vpop.f32.mrf.mxu0 }
 0x317   :  { %v2973_v21 = vpop.f32.mrf.mxu1 }
 0x318   :  { %v2974_v22 = vadd.f32 %v2973_v21, %v2933_v13  ;;  %v4742_v13 = vld [vmem:[#allocation8 + $0x50] sm:$0xff]   ;;  %v4747_v21 = vld [vmem:[#allocation8 + $0x8] sm:$0xff]  }
 0x319   :  { %v2975_v24 = vpop.f32.mrf.mxu1  ;;  %4073 = vmatprep.subr.bf16.mxu0 %v4742_v13 }
 0x31a   :  { %v2980_v4 = vmax.f32 %v2974_v22, 0.0  ;;  %v2976_v25 = vadd.f32 %v2975_v24, %v2935_v16  ;;  %v4744_v16 = vld [vmem:[#allocation8 + $0xd0] sm:$0xff]   ;;  %4074 = vmatpush3.bf16.msra.mxu0 %v4743_v14  ;;  %v4748_v22 = vld [vmem:[#allocation8 + $0xc8] sm:$0xff]  }
 0x31b   :  { %v2977_v26 = vpop.f32.mrf.mxu1  ;;  %4095 = vmatprep.subr.bf16.mxu1 %v4744_v16  ;;  %4075 = vmatprep.subr.bf16.mxu0 %v4746_v20  ;;  %v4767_v16 = vld [vmem:[#allocation8 + $0x108] sm:$0xff]   ;;  %v4769_v20 = vld [vmem:[#allocation8 + $0x100] sm:$0xff]  }
 0x31c   :  { %v2981_v27 = vmax.f32 %v2976_v25, 0.0  ;;  %v2993_v28 = vmul.f32 %v2986_v23, %v2980_v4  ;;  %4096 = vmatpush3.bf16.msra.mxu1 %v4745_v18  ;;  %v4749_v4 = vld [vmem:[#allocation8 + $0x88] sm:$0xff]   ;;  %v4750_v25 = vld [vmem:[#allocation8 + $0x40] sm:$0xff]  }
 0x31d   :  { %v2978_v29 = vpop.f32.mrf.mxu1  ;;  %4097 = vmatprep.subr.bf16.mxu1 %v4748_v22  ;;  %v4768_v18 = vld [vmem:[#allocation8 + $0x140] sm:$0xff]  }
 0x31e   :  { %v2994_v30 = vmul.f32 %v2990_v6, %v2981_v27  ;;  %v2996_v31 = vsel %vm2995_vm0, %v2993_v28, 0.0  ;;  %v4752_v6 = vld [vmem:[#allocation8 + $0xc0] sm:$0xff]   ;;  %4076 = vmatpush3.bf16.msra.mxu0 %v4747_v21  ;;  %v4754_v29 = vld [vmem:[#allocation8 + $0x178] sm:$0xff]  }
 0x31f   :  { %v4751_v27 = vld [vmem:[#allocation8] sm:$0xff]   ;;  %4077 = vmatprep.subr.bf16.mxu0 %v4750_v25 }
 0x320   :  { %v2997_v34 = vsel %vm2995_vm0, %v2994_v30, 0.0  ;;  %4098 = vmatpush3.bf16.msra.mxu1 %v4749_v4  ;;  %v4753_v28 = vld [vmem:[#allocation8 + $0x80] sm:$0xff]  }
 0x321   :  { %v2998_v36 = vadd.f32 %v2997_v34, %v2996_v31  ;;  %4099 = vmatprep.subr.bf16.mxu1 %v4752_v6 }
 0x322   :  { %4078 = vmatpush3.bf16.msra.mxu0 %v4751_v27 }
 0x323   :  { %2999 = vadd.xlane.f32.xlu0 %v2998_v36  ;;  %4107 = vmatprep.subr.bf16.mxu0 %v4754_v29  ;;  %v93_v29 = vld [vmem:[#allocation10 + $0x3] ss:$0 sm:$0xff] }
 0x324   :  { %4100 = vmatpush3.bf16.msra.mxu1 %v4753_v28 }
 0x3ac   :  { %v3000_v1 = vpop.xlane.xlu0 %2999 }
 0x3ad   :  { %v3001_v44 = vadd.f32 %v3000_v1, %v94_v0 }
 0x3af   :  { %v3002_v42 = vmax.f32 %v3001_v44, 0.0  ;;  %v4755_v44 = vld [vmem:[#allocation8 + $0x138] sm:$0xff]  }
 0x3b1   :  { %v3004_v38 = vrot.slane %v3002_v42, 6 }
 0x3b3   :  { %v3006_v58 = vmax.f32 %v3002_v42, %v3004_v38  ;;  %v4757_v38 = vld [vmem:[#allocation8 + $0x130] sm:$0xff]  }
 0x3b5   :  { %v3007_v5 = vsub.f32 %v3002_v42, %v3006_v58  ;;  %v3011_v39 = vrot.slane %v3006_v58, 2  ;;  %v4758_v58 = vld [vmem:[#allocation8 + $0x168] sm:$0xff]  }
 0x3b7   :  { %v3013_v7 = vsub.f32 %v3002_v42, %v3011_v39  ;;  %v3008_v8 = vmul.f32 1.442695, %v3007_v5  ;;  %v4756_v42 = vld [vmem:[#allocation8 + $0x170] sm:$0xff]   ;;  %v4759_v5 = vld [vmem:[#allocation8 + $0x128] sm:$0xff]   ;;  %v4760_v39 = vld [vmem:[#allocation8 + $0x160] sm:$0xff]  }
 0x3b9   :  { %v3014_v49 = vmul.f32 1.442695, %v3013_v7  ;;  %v4761_v7 = vld [vmem:[#allocation8 + $0x120] sm:$0xff]  }
 0x3bb   :  { %4782 = vpow2.f32 %v3014_v49  ;;  %v4763_v49 = vld [vmem:[#allocation8 + $0x118] sm:$0xff]  }
 0x3bc   :  { %4784 = vpow2.f32 %v3008_v8  ;;  %v4762_v8 = vld [vmem:[#allocation8 + $0x158] sm:$0xff]  }
 0x3c8   :  { %v4783_v9 = vpop.eup %4782 }
 0x3c9   :  { %v3017_v10 = vrot.slane %v4783_v9, 6  ;;  %v4785_v11 = vpop.eup %4784 }
 0x3cb   :  { %v3019_v12 = vadd.f32 %v4785_v11, %v3017_v10 }
 0x3cd   :  { %4786 = vrcp.f32 %v3019_v12  ;;  %v4766_v12 = vld [vmem:[#allocation8 + $0x148] sm:$0xff]  }
 0x3da   :  { %v4787_v19 = vpop.eup %4786 }
 0x3db   :  { %v3021_v23 = vmul.f32 %v4787_v19, %v4785_v11  ;;  %v3023_v24 = vrot.slane %v4787_v19, 2  ;;  %v4765_v11 = vld [vmem:[#allocation8 + $0x110] sm:$0xff]  }
 0x3dd   :  { %3028 = vperm.xlu1 %4144, %v3021_v23   ;;  %v3025_v26 = vmul.f32 %v4783_v9, %v3023_v24  ;;  %v4764_v9 = vld [vmem:[#allocation8 + $0x150] sm:$0xff]  }
 0x3df   :  { %3039 = vperm.xlu0 %4143, %v3025_v26  }
 0x458   :  { %v5081_v30 = vpop.permute.xlu1 %3028 }
 0x459   :  { %v3032_v34 = vmul.f32 %v5045_v17, %v5081_v30  ;;  %v3034_v45 = vmul.f32 %v5059_v33, %v5081_v30  ;;  %v3031_v47 = vmul.f32 %v5043_v15, %v5081_v30  ;;  %v3033_v62 = vmul.f32 %v5057_v32, %v5081_v30 }
 0x45a   :  { %v5083_v31 = vpop.permute.xlu0 %3039  ;;  %v3036_v41 = vmul.f32 %v5071_v3, %v5081_v30  ;;  %v3035_v14 = vmul.f32 %v5069_v2, %v5081_v30 }
 0x45b   :  { %v3043_v36 = vmul.f32 %v5045_v17, %v5083_v31  ;;  %v3045_v37 = vmul.f32 %v5059_v33, %v5083_v31  ;;  %v3042_v43 = vmul.f32 %v5043_v15, %v5083_v31  ;;  %v3044_v40 = vmul.f32 %v5057_v32, %v5083_v31 }
 0x45c   :  { %v3047_v17 = vmul.f32 %v5071_v3, %v5083_v31  ;;  %v3046_v10 = vmul.f32 %v5069_v2, %v5083_v31 }
 0x45d   :  { %v3055_v46 = vrot.slane %v3043_v36, 6  ;;  %v3057_v48 = vrot.slane %v3045_v37, 6  ;;  %v3054_v54 = vrot.slane %v3042_v43, 6  ;;  %v3056_v50 = vrot.slane %v3044_v40, 6 }
 0x45e   :  { %v3059_v51 = vrot.slane %v3047_v17, 6  ;;  %v3058_v13 = vrot.slane %v3046_v10, 6  ;;  %v3601_v40 = vand.u32 127, %v386_v35 }
 0x45f   :  { %v3067_v52 = vadd.f32 %v3055_v46, %v3032_v34  ;;  %v3069_v53 = vadd.f32 %v3057_v48, %v3034_v45  ;;  %v3066_v33 = vadd.f32 %v3054_v54, %v3031_v47  ;;  %v3068_v59 = vadd.f32 %v3056_v50, %v3033_v62 }
 0x460   :  { %v3071_v55 = vadd.f32 %v3059_v51, %v3036_v41  ;;  %v3070_v19 = vadd.f32 %v3058_v13, %v3035_v14  ;;  %vm3602_vm1 = vcmp.eq.s32.totalorder %v3601_v40, 8  ;;  %vm3607_vm2 = vcmp.eq.s32.totalorder %v3601_v40, 9 }
 0x461   :  { %v3073_v15 = vpack.c.bf16 %v3067_v52, %v3067_v52  ;;  %v3075_v56 = vpack.c.bf16 %v3069_v53, %v3069_v53  ;;  %v3072_v57 = vpack.c.bf16 %v3066_v33, %v3066_v33  ;;  %v3074_v32 = vpack.c.bf16 %v3068_v59, %v3068_v59 }
 0x462   :  { %v3077_v60 = vpack.c.bf16 %v3071_v55, %v3071_v55  ;;  %v3076_v21 = vpack.c.bf16 %v3070_v19, %v3070_v19 }
 0x463   :  { %v3181_v61 = vrot.slane %v3073_v15, 1  ;;  %v3183_v63 = vrot.slane %v3075_v56, 1  ;;  %v3180_v0 = vrot.slane %v3072_v57, 1  ;;  %v3182_v1 = vrot.slane %v3074_v32, 1 }
 0x464   :  { %v3185_v3 = vrot.slane %v3077_v60, 1  ;;  %v3184_v22 = vrot.slane %v3076_v21, 1 }
 0x465   :  { %3512 = vmatprep.mubr.bf16.mxu0 %v3181_v61  ;;  %3552 = vmatprep.mubr.bf16.mxu1 %v3183_v63 }
 0x466   :  { %3513 = vmatmul.mubr.bf16.vlgmr.msra.gmra.mxu0 %v3180_v0  ;;  %3553 = vmatmul.mubr.bf16.vlgmr.msra.gmra.mxu1 %v3182_v1 }
 0x467   :  { %4108 = vmatpush3.bf16.msra.mxu0 %v4755_v44  ;;  %3592 = vmatprep.mubr.bf16.mxu0 %v3185_v3 }
 0x468   :  { %4109 = vmatprep.subr.bf16.mxu0 %v4756_v42 }
 0x46b   :  { %4110 = vmatpush3.bf16.msra.mxu0 %v4757_v38 }
 0x46c   :  { %4111 = vmatprep.subr.bf16.mxu0 %v4758_v58 }
 0x46f   :  { %4112 = vmatpush3.bf16.msra.mxu0 %v4759_v5 }
 0x470   :  { %4113 = vmatprep.subr.bf16.mxu0 %v4760_v39 }
 0x473   :  { %4114 = vmatpush3.bf16.msra.mxu0 %v4761_v7 }
 0x474   :  { %4115 = vmatprep.subr.bf16.mxu0 %v4762_v8 }
 0x477   :  { %4116 = vmatpush3.bf16.msra.mxu0 %v4763_v49 }
 0x478   :  { %4117 = vmatprep.subr.bf16.mxu0 %v4764_v9 }
 0x47b   :  { %4118 = vmatpush3.bf16.msra.mxu0 %v4765_v11 }
 0x47c   :  { %4119 = vmatprep.subr.bf16.mxu0 %v4766_v12 }
 0x47f   :  { %4120 = vmatpush3.bf16.msra.mxu0 %v4767_v16 }
 0x480   :  { %4121 = vmatprep.subr.bf16.mxu0 %v4768_v18 }
 0x483   :  { %4122 = vmatpush3.bf16.msra.mxu0 %v4769_v20 }
 0x486   :  { %3593 = vmatmul.mubr.bf16.vlgmr.msra.gmra.mxu0 %v3184_v22 }
 0x526   :  { %v4079_v23 = vpop.f32.mrf.mxu0  ;;  %v4101_v24 = vpop.f32.mrf.mxu1 }
 0x528   :  { %v4080_v4 = vpop.f32.mrf.mxu0  ;;  %v4102_v25 = vpop.f32.mrf.mxu1 }
 0x529   :  { %v4081_v28 = vadd.f32 %v4080_v4, %v4079_v23  ;;  %v4103_v37 = vadd.f32 %v4102_v25, %v4101_v24 }
 0x52a   :  { %v4082_v6 = vpop.f32.mrf.mxu0  ;;  %v4104_v26 = vpop.f32.mrf.mxu1 }
 0x52b   :  { %v3515_v34 = vadd.f32 %v4081_v28, %v93_v29 }
 0x52c   :  { %v4083_v27 = vpop.f32.mrf.mxu0  ;;  %v4105_v2 = vpop.f32.mrf.mxu1 }
 0x52d   :  { %v3555_v45 = vadd.f32 %v4103_v37, %v3515_v34 }
 0x546   :  { %v4123_v36 = vpop.f32.mrf.mxu0 }
 0x548   :  { %v4124_v43 = vpop.f32.mrf.mxu0 }
 0x549   :  { %v4125_v47 = vadd.f32 %v4124_v43, %v4123_v36 }
 0x54a   :  { %v4126_v62 = vpop.f32.mrf.mxu0 }
 0x54b   :  { %v3595_v17 = vadd.f32 %v4125_v47, %v3555_v45 }
 0x54c   :  { %v4127_v46 = vpop.f32.mrf.mxu0 }
 0x54d   :  { %v3604_v48 = vrot.slane %v3595_v17, 6 }
 0x54f   :  { %v3606_v54 = vsel %vm3602_vm1, %v5081_v30, %v3604_v48 }
 0x550   :  { %v3609_v50 = vrot.slane %v3606_v54, 2 }
 0x552   :  { %v3611_v41 = vsel %vm3607_vm2, %v5083_v31, %v3609_v50 }
 0x553   :  { %3612 = vst [vmem:[#allocation11] sm:$0x3] %v3611_v41 }
 0x554   :  { %4900 = shalt.err (!%p4897_p1)
}
 0x555   :  { %3622 = dma.vmem_to_hbm [thread:$0]  %s3620_s4, 32, %s5120_s5, [#allocation4]  }
 0x556   :  { %4915 = dma.done.wait [#allocation4], 32  }
 0x557   :  { %4916 = vsyncadd [#allocation4], 4294967264 }
 0x558   :  { %3626 = vsyncpa [#allocation3], 1 }
 0x559   :  { %3627 = vsyncpa [#allocation6], 1 }
 0x55a   :  { %3628 = vsyncpa [#allocation9], 1 }
 0x55b   :  { %3629 = vsyncpa [#allocation4], 1 }

</bundles_post_ra>
